<compile_context>
chip_gen: v7x
topology: tpu7x:2x2x1
jax: 0.10.0
libtpu: 0.0.40
codegen_flags: <defaults>
</compile_context>

<pallas_src>
import functools

import jax
import jax.numpy as jnp
import numpy as np
from jax.experimental import pallas as pl
from jax.experimental.pallas import tpu as pltpu


def _dilate_attn_kernel(q_ref, k_ref, v_ref, o_ref, *,
                        scale, kernel_size, dilation, block_h, w, head_dim,
                        num_h_tiles):
    ks = kernel_size
    dil = dilation
    pad = dil * (ks - 1) // 2
    # Halo window height, rounded up to a sublane multiple (host padded k/v so
    # this window never reads out of bounds).
    win_h = block_h + 2 * pad
    win_h += (-win_h) % 8

    if num_h_tiles == 1:
        row0 = 0                                            # fully static path
    else:
        row0 = pl.multiple_of(pl.program_id(1) * block_h, 8)

    q = q_ref[0]                                            # (D, TH, W), input dtype

    # Halo windows of the zero-padded k / v for this row tile. The k/v block is
    # the whole padded (D, Hp, Wp) slab for this head (constant BlockSpec index
    # over the row-tile axis -> DMA'd once per head, then sliced in VMEM).
    kwin = k_ref[0, :, pl.ds(row0, win_h), :]               # (D, win_h, Wp)
    vwin = v_ref[0, :, pl.ds(row0, win_h), :]               # (D, win_h, Wp)

    # ---- pass 1: q.k logits for each (static) neighbor of the window --------
    # D is a leading axis, so the reduction over head_dim is D-1 full-vreg VPU
    # adds; multiplies stay in the input dtype, accumulation in f32.
    logits = []
    for ki in range(ks):
        for kj in range(ks):
            ksl = kwin[:, ki * dil:ki * dil + block_h, kj * dil:kj * dil + w]
            prod = (q * ksl).astype(jnp.float32)            # (D, TH, W)
            logits.append(jnp.sum(prod, axis=0) * scale)    # (TH, W) f32

    # ---- softmax over the K2 neighborhood (max-stabilized, f32) -------------
    m = logits[0]
    for l in logits[1:]:
        m = jnp.maximum(m, l)
    ps = [jnp.exp(l - m) for l in logits]                   # EUP
    denom = ps[0]
    for p in ps[1:]:
        denom = denom + p
    # Approx reciprocal (EUP slot, off the VALU) + one Newton-Raphson step to
    # recover full f32 precision (raw approx was the source of the previous
    # 2/8192-element tolerance failure).
    inv = pl.reciprocal(denom, approx=True)
    inv = inv * (2.0 - denom * inv)

    # ---- pass 2: attention-weighted sum of v over the neighborhood ----------
    acc = None
    idx = 0
    for ki in range(ks):
        for kj in range(ks):
            vsl = vwin[:, ki * dil:ki * dil + block_h, kj * dil:kj * dil + w]
            term = ps[idx][None, :, :] * vsl.astype(jnp.float32)   # (D, TH, W)
            acc = term if acc is None else acc + term
            idx += 1

    o_ref[0] = (acc * inv[None, :, :]).astype(o_ref.dtype)


def _pick_block_h(H):
    # Full rows if small / not sublane-aligned; otherwise the largest
    # multiple-of-8 divisor of H that is <= 64 (bounds q/out tiles).
    if H <= 64 or H % 8 != 0:
        return H
    for cand in range(64, 7, -8):
        if H % cand == 0:
            return cand
    return H


def dilate_attention(q, k, v, head_dim, kernel_size=3, dilation=1,
                     qk_scale=None, block_h=None):
    B, d, H, W = q.shape
    assert d % head_dim == 0
    nh = d // head_dim
    D = head_dim
    BH = B * nh
    pad = dilation * (kernel_size - 1) // 2
    scale = float(qk_scale) if qk_scale is not None else head_dim ** (-0.5)

    if block_h is None:
        block_h = _pick_block_h(H)
    assert H % block_h == 0, "block_h must divide H"
    num_h_tiles = H // block_h
    if num_h_tiles > 1:
        assert block_h % 8 == 0, "row tile must be a multiple of 8 sublanes"

    # Extra bottom rows so the in-kernel halo window height is a multiple of 8.
    extra = (-(block_h + 2 * pad)) % 8
    Hp = H + 2 * pad + extra
    Wp = W + 2 * pad

    # ---- host glue: layout only, no K2 expansion ----------------------------
    # Channels split as (heads, head_dim) with heads outer, matching the
    # PyTorch reshape([B, d//hd, hd, ...]).
    q_r = q.reshape(BH, D, H, W)
    k_p = jnp.pad(k, ((0, 0), (0, 0), (pad, pad + extra), (pad, pad))).reshape(BH, D, Hp, Wp)
    v_p = jnp.pad(v, ((0, 0), (0, 0), (pad, pad + extra), (pad, pad))).reshape(BH, D, Hp, Wp)

    kernel = functools.partial(
        _dilate_attn_kernel, scale=scale, kernel_size=kernel_size,
        dilation=dilation, block_h=block_h, w=W, head_dim=D,
        num_h_tiles=num_h_tiles)

    out = pl.pallas_call(
        kernel,
        out_shape=jax.ShapeDtypeStruct((BH, D, H, W), q.dtype),
        grid_spec=pltpu.PrefetchScalarGridSpec(
            num_scalar_prefetch=0,
            grid=(BH, num_h_tiles),
            in_specs=[
                pl.BlockSpec((1, D, block_h, W), lambda i, t: (i, 0, t, 0)),
                # k/v: one padded per-head block, constant over the row-tile
                # axis -> fetched once per head and kept resident in VMEM.
                pl.BlockSpec((1, D, Hp, Wp), lambda i, t: (i, 0, 0, 0)),
                pl.BlockSpec((1, D, Hp, Wp), lambda i, t: (i, 0, 0, 0)),
            ],
            out_specs=pl.BlockSpec((1, D, block_h, W), lambda i, t: (i, 0, t, 0)),
        ),
        compiler_params=pltpu.CompilerParams(
            dimension_semantics=("parallel", "parallel"),
            vmem_limit_bytes=32 * 1024 * 1024,
        ),
    )(q_r, k_p, v_p)

    # (BH, D, H, W) -> (B, H, W, d), matching
    # (attn @ v).transpose(1, 2).reshape(B, H, W, d) in the PyTorch module.
    return (out.reshape(B, nh, D, H, W)
               .transpose(0, 3, 4, 1, 2)
               .reshape(B, H, W, d))


# ------------------------- pure-JAX reference --------------------------------
def _unfold(x, kernel_size, dilation, pad, H, W):
    # Matches torch.nn.Unfold(kernel_size, dilation, padding=pad, stride=1).
    xp = jnp.pad(x, ((0, 0), (0, 0), (pad, pad), (pad, pad)))
    patches = [
        xp[:, :, ki * dilation:ki * dilation + H, kj * dilation:kj * dilation + W]
        for ki in range(kernel_size) for kj in range(kernel_size)
    ]
    return jnp.stack(patches, axis=2)  # (B, d, K2, H, W)


def dilate_attention_ref(q, k, v, head_dim, kernel_size=3, dilation=1, qk_scale=None):
    """Pure-JAX reference mirroring the PyTorch forward pass."""
    B, d, H, W = q.shape
    nh = d // head_dim
    K2 = kernel_size * kernel_size
    HW = H * W
    scale = qk_scale if qk_scale is not None else head_dim ** (-0.5)
    pad = dilation * (kernel_size - 1) // 2

    q_r = q.reshape(B, nh, head_dim, 1, HW).transpose(0, 1, 4, 3, 2)          # (B,nh,HW,1,D)
    k_u = (_unfold(k, kernel_size, dilation, pad, H, W)
             .reshape(B, nh, head_dim, K2, HW).transpose(0, 1, 4, 2, 3))      # (B,nh,HW,D,K2)
    attn = jnp.matmul(q_r, k_u) * scale                                       # (B,nh,HW,1,K2)
    attn = jax.nn.softmax(attn, axis=-1)
    v_u = (_unfold(v, kernel_size, dilation, pad, H, W)
             .reshape(B, nh, head_dim, K2, HW).transpose(0, 1, 4, 3, 2))      # (B,nh,HW,K2,D)
    x = jnp.matmul(attn, v_u)                                                 # (B,nh,HW,1,D)
    return x.transpose(0, 2, 1, 3, 4).reshape(B, H, W, d)


if __name__ == "__main__":
    # Small shapes consistent with the module: B=2, d=16 channels, head_dim=8
    # (=> 2 heads), 16x16 spatial, kernel_size=3.
    B, d, H, W = 2, 16, 16, 16
    head_dim = 8

    key = jax.random.PRNGKey(0)
    kq, kk, kv = jax.random.split(key, 3)
    q = jax.random.normal(kq, (B, d, H, W), dtype=jnp.float32)
    k = jax.random.normal(kk, (B, d, H, W), dtype=jnp.float32)
    v = jax.random.normal(kv, (B, d, H, W), dtype=jnp.float32)

    # dilation=1 with explicit row tiling (2 row tiles per head):
    # exercises the dynamic halo-window path.
    out1 = jax.block_until_ready(
        dilate_attention(q, k, v, head_dim, dilation=1, block_h=8))
    ref1 = jax.block_until_ready(
        dilate_attention_ref(q, k, v, head_dim, dilation=1))
    np.testing.assert_allclose(np.asarray(out1), np.asarray(ref1),
                               rtol=2e-3, atol=2e-3)

    # dilation=2 with a single row tile per head: exercises the static path.
    out2 = jax.block_until_ready(
        dilate_attention(q, k, v, head_dim, dilation=2))
    ref2 = jax.block_until_ready(
        dilate_attention_ref(q, k, v, head_dim, dilation=2))
    np.testing.assert_allclose(np.asarray(out2), np.asarray(ref2),
                               rtol=2e-3, atol=2e-3)

    print("KERNEL_OK")
</pallas_src>

<mosaic_0001>
module attributes {stable_mosaic.version = 11 : i64} {
  func.func @_dilate_attn_kernel(%arg0: i32, %arg1: i32, %arg2: memref<1x8x8x16xf32, #tpu.memory_space<vmem>>, %arg3: memref<1x8x24x18xf32, #tpu.memory_space<vmem>>, %arg4: memref<1x8x24x18xf32, #tpu.memory_space<vmem>>, %arg5: memref<1x8x8x16xf32, #tpu.memory_space<vmem>>) attributes {dimension_semantics = [#tpu.dimension_semantics<parallel>, #tpu.dimension_semantics<parallel>], iteration_bounds = array<i64: 4, 2>, scalar_prefetch = 0 : i64, scratch_operands = 0 : i64, tpu.core_type = #tpu.core_type<tc>, window_params = [{transform_indices = @transform_0, window_bounds = array<i64: 1, 8, 8, 16>}, {transform_indices = @transform_1, window_bounds = array<i64: 1, 8, 24, 18>}, {transform_indices = @transform_2, window_bounds = array<i64: 1, 8, 24, 18>}, {transform_indices = @transform_3, window_bounds = array<i64: 1, 8, 8, 16>}]} {
    %c8_i32 = arith.constant 8 : i32
    %0 = arith.muli %arg1, %c8_i32 : i32
    %1 = tpu.assume_multiple %0, 8 : i32
    %c0 = arith.constant 0 : index
    %c0_0 = arith.constant 0 : index
    %c0_1 = arith.constant 0 : index
    %c0_2 = arith.constant 0 : index
    %2 = vector.load %arg2[%c0, %c0_0, %c0_1, %c0_2] : memref<1x8x8x16xf32, #tpu.memory_space<vmem>>, vector<1x8x8x16xf32>
    %3 = vector.shape_cast %2 : vector<1x8x8x16xf32> to vector<8x8x16xf32>
    %c0_3 = arith.constant 0 : index
    %c0_4 = arith.constant 0 : index
    %4 = arith.index_cast %1 : i32 to index
    %c0_5 = arith.constant 0 : index
    %5 = vector.load %arg3[%c0_3, %c0_4, %4, %c0_5] : memref<1x8x24x18xf32, #tpu.memory_space<vmem>>, vector<1x8x16x18xf32>
    %6 = vector.shape_cast %5 : vector<1x8x16x18xf32> to vector<8x16x18xf32>
    %c0_6 = arith.constant 0 : index
    %c0_7 = arith.constant 0 : index
    %7 = arith.index_cast %1 : i32 to index
    %c0_8 = arith.constant 0 : index
    %8 = vector.load %arg4[%c0_6, %c0_7, %7, %c0_8] : memref<1x8x24x18xf32, #tpu.memory_space<vmem>>, vector<1x8x16x18xf32>
    %9 = vector.shape_cast %8 : vector<1x8x16x18xf32> to vector<8x16x18xf32>
    %10 = vector.extract_strided_slice %6 {offsets = [0, 0, 0], sizes = [8, 8, 16], strides = [1, 1, 1]} : vector<8x16x18xf32> to vector<8x8x16xf32>
    %11 = arith.mulf %3, %10 : vector<8x8x16xf32>
    %cst = arith.constant dense<0.000000e+00> : vector<8x16xf32>
    %12 = vector.multi_reduction <add>, %11, %cst [0] : vector<8x8x16xf32> to vector<8x16xf32>
    %cst_9 = arith.constant 0.353553385 : f32
    %13 = vector.broadcast %cst_9 : f32 to vector<8x16xf32>
    %14 = arith.mulf %12, %13 : vector<8x16xf32>
    %15 = vector.extract_strided_slice %6 {offsets = [0, 0, 1], sizes = [8, 8, 16], strides = [1, 1, 1]} : vector<8x16x18xf32> to vector<8x8x16xf32>
    %16 = arith.mulf %3, %15 : vector<8x8x16xf32>
    %cst_10 = arith.constant dense<0.000000e+00> : vector<8x16xf32>
    %17 = vector.multi_reduction <add>, %16, %cst_10 [0] : vector<8x8x16xf32> to vector<8x16xf32>
    %cst_11 = arith.constant 0.353553385 : f32
    %18 = vector.broadcast %cst_11 : f32 to vector<8x16xf32>
    %19 = arith.mulf %17, %18 : vector<8x16xf32>
    %20 = vector.extract_strided_slice %6 {offsets = [0, 0, 2], sizes = [8, 8, 16], strides = [1, 1, 1]} : vector<8x16x18xf32> to vector<8x8x16xf32>
    %21 = arith.mulf %3, %20 : vector<8x8x16xf32>
    %cst_12 = arith.constant dense<0.000000e+00> : vector<8x16xf32>
    %22 = vector.multi_reduction <add>, %21, %cst_12 [0] : vector<8x8x16xf32> to vector<8x16xf32>
    %cst_13 = arith.constant 0.353553385 : f32
    %23 = vector.broadcast %cst_13 : f32 to vector<8x16xf32>
    %24 = arith.mulf %22, %23 : vector<8x16xf32>
    %25 = vector.extract_strided_slice %6 {offsets = [0, 1, 0], sizes = [8, 8, 16], strides = [1, 1, 1]} : vector<8x16x18xf32> to vector<8x8x16xf32>
    %26 = arith.mulf %3, %25 : vector<8x8x16xf32>
    %cst_14 = arith.constant dense<0.000000e+00> : vector<8x16xf32>
    %27 = vector.multi_reduction <add>, %26, %cst_14 [0] : vector<8x8x16xf32> to vector<8x16xf32>
    %cst_15 = arith.constant 0.353553385 : f32
    %28 = vector.broadcast %cst_15 : f32 to vector<8x16xf32>
    %29 = arith.mulf %27, %28 : vector<8x16xf32>
    %30 = vector.extract_strided_slice %6 {offsets = [0, 1, 1], sizes = [8, 8, 16], strides = [1, 1, 1]} : vector<8x16x18xf32> to vector<8x8x16xf32>
    %31 = arith.mulf %3, %30 : vector<8x8x16xf32>
    %cst_16 = arith.constant dense<0.000000e+00> : vector<8x16xf32>
    %32 = vector.multi_reduction <add>, %31, %cst_16 [0] : vector<8x8x16xf32> to vector<8x16xf32>
    %cst_17 = arith.constant 0.353553385 : f32
    %33 = vector.broadcast %cst_17 : f32 to vector<8x16xf32>
    %34 = arith.mulf %32, %33 : vector<8x16xf32>
    %35 = vector.extract_strided_slice %6 {offsets = [0, 1, 2], sizes = [8, 8, 16], strides = [1, 1, 1]} : vector<8x16x18xf32> to vector<8x8x16xf32>
    %36 = arith.mulf %3, %35 : vector<8x8x16xf32>
    %cst_18 = arith.constant dense<0.000000e+00> : vector<8x16xf32>
    %37 = vector.multi_reduction <add>, %36, %cst_18 [0] : vector<8x8x16xf32> to vector<8x16xf32>
    %cst_19 = arith.constant 0.353553385 : f32
    %38 = vector.broadcast %cst_19 : f32 to vector<8x16xf32>
    %39 = arith.mulf %37, %38 : vector<8x16xf32>
    %40 = vector.extract_strided_slice %6 {offsets = [0, 2, 0], sizes = [8, 8, 16], strides = [1, 1, 1]} : vector<8x16x18xf32> to vector<8x8x16xf32>
    %41 = arith.mulf %3, %40 : vector<8x8x16xf32>
    %cst_20 = arith.constant dense<0.000000e+00> : vector<8x16xf32>
    %42 = vector.multi_reduction <add>, %41, %cst_20 [0] : vector<8x8x16xf32> to vector<8x16xf32>
    %cst_21 = arith.constant 0.353553385 : f32
    %43 = vector.broadcast %cst_21 : f32 to vector<8x16xf32>
    %44 = arith.mulf %42, %43 : vector<8x16xf32>
    %45 = vector.extract_strided_slice %6 {offsets = [0, 2, 1], sizes = [8, 8, 16], strides = [1, 1, 1]} : vector<8x16x18xf32> to vector<8x8x16xf32>
    %46 = arith.mulf %3, %45 : vector<8x8x16xf32>
    %cst_22 = arith.constant dense<0.000000e+00> : vector<8x16xf32>
    %47 = vector.multi_reduction <add>, %46, %cst_22 [0] : vector<8x8x16xf32> to vector<8x16xf32>
    %cst_23 = arith.constant 0.353553385 : f32
    %48 = vector.broadcast %cst_23 : f32 to vector<8x16xf32>
    %49 = arith.mulf %47, %48 : vector<8x16xf32>
    %50 = vector.extract_strided_slice %6 {offsets = [0, 2, 2], sizes = [8, 8, 16], strides = [1, 1, 1]} : vector<8x16x18xf32> to vector<8x8x16xf32>
    %51 = arith.mulf %3, %50 : vector<8x8x16xf32>
    %cst_24 = arith.constant dense<0.000000e+00> : vector<8x16xf32>
    %52 = vector.multi_reduction <add>, %51, %cst_24 [0] : vector<8x8x16xf32> to vector<8x16xf32>
    %cst_25 = arith.constant 0.353553385 : f32
    %53 = vector.broadcast %cst_25 : f32 to vector<8x16xf32>
    %54 = arith.mulf %52, %53 : vector<8x16xf32>
    %55 = arith.maximumf %14, %19 : vector<8x16xf32>
    %56 = arith.maximumf %55, %24 : vector<8x16xf32>
    %57 = arith.maximumf %56, %29 : vector<8x16xf32>
    %58 = arith.maximumf %57, %34 : vector<8x16xf32>
    %59 = arith.maximumf %58, %39 : vector<8x16xf32>
    %60 = arith.maximumf %59, %44 : vector<8x16xf32>
    %61 = arith.maximumf %60, %49 : vector<8x16xf32>
    %62 = arith.maximumf %61, %54 : vector<8x16xf32>
    %63 = arith.subf %14, %62 : vector<8x16xf32>
    %64 = math.exp %63 : vector<8x16xf32>
    %65 = arith.subf %19, %62 : vector<8x16xf32>
    %66 = math.exp %65 : vector<8x16xf32>
    %67 = arith.subf %24, %62 : vector<8x16xf32>
    %68 = math.exp %67 : vector<8x16xf32>
    %69 = arith.subf %29, %62 : vector<8x16xf32>
    %70 = math.exp %69 : vector<8x16xf32>
    %71 = arith.subf %34, %62 : vector<8x16xf32>
    %72 = math.exp %71 : vector<8x16xf32>
    %73 = arith.subf %39, %62 : vector<8x16xf32>
    %74 = math.exp %73 : vector<8x16xf32>
    %75 = arith.subf %44, %62 : vector<8x16xf32>
    %76 = math.exp %75 : vector<8x16xf32>
    %77 = arith.subf %49, %62 : vector<8x16xf32>
    %78 = math.exp %77 : vector<8x16xf32>
    %79 = arith.subf %54, %62 : vector<8x16xf32>
    %80 = math.exp %79 : vector<8x16xf32>
    %81 = arith.addf %64, %66 : vector<8x16xf32>
    %82 = arith.addf %81, %68 : vector<8x16xf32>
    %83 = arith.addf %82, %70 : vector<8x16xf32>
    %84 = arith.addf %83, %72 : vector<8x16xf32>
    %85 = arith.addf %84, %74 : vector<8x16xf32>
    %86 = arith.addf %85, %76 : vector<8x16xf32>
    %87 = arith.addf %86, %78 : vector<8x16xf32>
    %88 = arith.addf %87, %80 : vector<8x16xf32>
    %89 = tpu.reciprocal %88 {approx = true} : vector<8x16xf32> -> vector<8x16xf32>
    %90 = arith.mulf %88, %89 : vector<8x16xf32>
    %cst_26 = arith.constant 2.000000e+00 : f32
    %91 = vector.broadcast %cst_26 : f32 to vector<8x16xf32>
    %92 = arith.subf %91, %90 : vector<8x16xf32>
    %93 = arith.mulf %89, %92 : vector<8x16xf32>
    %94 = vector.extract_strided_slice %9 {offsets = [0, 0, 0], sizes = [8, 8, 16], strides = [1, 1, 1]} : vector<8x16x18xf32> to vector<8x8x16xf32>
    %95 = vector.shape_cast %64 : vector<8x16xf32> to vector<1x8x16xf32>
    %96 = vector.broadcast %95 : vector<1x8x16xf32> to vector<8x8x16xf32>
    %97 = arith.mulf %96, %94 : vector<8x8x16xf32>
    %98 = vector.extract_strided_slice %9 {offsets = [0, 0, 1], sizes = [8, 8, 16], strides = [1, 1, 1]} : vector<8x16x18xf32> to vector<8x8x16xf32>
    %99 = vector.shape_cast %66 : vector<8x16xf32> to vector<1x8x16xf32>
    %100 = vector.broadcast %99 : vector<1x8x16xf32> to vector<8x8x16xf32>
    %101 = arith.mulf %100, %98 : vector<8x8x16xf32>
    %102 = arith.addf %97, %101 : vector<8x8x16xf32>
    %103 = vector.extract_strided_slice %9 {offsets = [0, 0, 2], sizes = [8, 8, 16], strides = [1, 1, 1]} : vector<8x16x18xf32> to vector<8x8x16xf32>
    %104 = vector.shape_cast %68 : vector<8x16xf32> to vector<1x8x16xf32>
    %105 = vector.broadcast %104 : vector<1x8x16xf32> to vector<8x8x16xf32>
    %106 = arith.mulf %105, %103 : vector<8x8x16xf32>
    %107 = arith.addf %102, %106 : vector<8x8x16xf32>
    %108 = vector.extract_strided_slice %9 {offsets = [0, 1, 0], sizes = [8, 8, 16], strides = [1, 1, 1]} : vector<8x16x18xf32> to vector<8x8x16xf32>
    %109 = vector.shape_cast %70 : vector<8x16xf32> to vector<1x8x16xf32>
    %110 = vector.broadcast %109 : vector<1x8x16xf32> to vector<8x8x16xf32>
    %111 = arith.mulf %110, %108 : vector<8x8x16xf32>
    %112 = arith.addf %107, %111 : vector<8x8x16xf32>
    %113 = vector.extract_strided_slice %9 {offsets = [0, 1, 1], sizes = [8, 8, 16], strides = [1, 1, 1]} : vector<8x16x18xf32> to vector<8x8x16xf32>
    %114 = vector.shape_cast %72 : vector<8x16xf32> to vector<1x8x16xf32>
    %115 = vector.broadcast %114 : vector<1x8x16xf32> to vector<8x8x16xf32>
    %116 = arith.mulf %115, %113 : vector<8x8x16xf32>
    %117 = arith.addf %112, %116 : vector<8x8x16xf32>
    %118 = vector.extract_strided_slice %9 {offsets = [0, 1, 2], sizes = [8, 8, 16], strides = [1, 1, 1]} : vector<8x16x18xf32> to vector<8x8x16xf32>
    %119 = vector.shape_cast %74 : vector<8x16xf32> to vector<1x8x16xf32>
    %120 = vector.broadcast %119 : vector<1x8x16xf32> to vector<8x8x16xf32>
    %121 = arith.mulf %120, %118 : vector<8x8x16xf32>
    %122 = arith.addf %117, %121 : vector<8x8x16xf32>
    %123 = vector.extract_strided_slice %9 {offsets = [0, 2, 0], sizes = [8, 8, 16], strides = [1, 1, 1]} : vector<8x16x18xf32> to vector<8x8x16xf32>
    %124 = vector.shape_cast %76 : vector<8x16xf32> to vector<1x8x16xf32>
    %125 = vector.broadcast %124 : vector<1x8x16xf32> to vector<8x8x16xf32>
    %126 = arith.mulf %125, %123 : vector<8x8x16xf32>
    %127 = arith.addf %122, %126 : vector<8x8x16xf32>
    %128 = vector.extract_strided_slice %9 {offsets = [0, 2, 1], sizes = [8, 8, 16], strides = [1, 1, 1]} : vector<8x16x18xf32> to vector<8x8x16xf32>
    %129 = vector.shape_cast %78 : vector<8x16xf32> to vector<1x8x16xf32>
    %130 = vector.broadcast %129 : vector<1x8x16xf32> to vector<8x8x16xf32>
    %131 = arith.mulf %130, %128 : vector<8x8x16xf32>
    %132 = arith.addf %127, %131 : vector<8x8x16xf32>
    %133 = vector.extract_strided_slice %9 {offsets = [0, 2, 2], sizes = [8, 8, 16], strides = [1, 1, 1]} : vector<8x16x18xf32> to vector<8x8x16xf32>
    %134 = vector.shape_cast %80 : vector<8x16xf32> to vector<1x8x16xf32>
    %135 = vector.broadcast %134 : vector<1x8x16xf32> to vector<8x8x16xf32>
    %136 = arith.mulf %135, %133 : vector<8x8x16xf32>
    %137 = arith.addf %132, %136 : vector<8x8x16xf32>
    %138 = vector.shape_cast %93 : vector<8x16xf32> to vector<1x8x16xf32>
    %139 = vector.broadcast %138 : vector<1x8x16xf32> to vector<8x8x16xf32>
    %140 = arith.mulf %137, %139 : vector<8x8x16xf32>
    %c0_27 = arith.constant 0 : index
    %c0_28 = arith.constant 0 : index
    %c0_29 = arith.constant 0 : index
    %c0_30 = arith.constant 0 : index
    %141 = vector.load %arg5[%c0_27, %c0_28, %c0_29, %c0_30] : memref<1x8x8x16xf32, #tpu.memory_space<vmem>>, vector<1x8x8x16xf32>
    %142 = vector.shape_cast %141 : vector<1x8x8x16xf32> to vector<8x8x16xf32>
    %143 = vector.shape_cast %140 : vector<8x8x16xf32> to vector<1x8x8x16xf32>
    tpu.vector_store %arg5[%c0_27, %c0_28, %c0_29, %c0_30], %143 {strides = array<i32>} : memref<1x8x8x16xf32, #tpu.memory_space<vmem>>, vector<1x8x8x16xf32>,
    return
  }
  func.func @transform_0(%arg0: i32, %arg1: i32) -> (i32, i32, i32, i32) {
    %c0_i32 = arith.constant 0 : i32
    %c0_i32_0 = arith.constant 0 : i32
    %c0_i32_1 = arith.constant 0 : i32
    return %arg0, %c0_i32, %arg1, %c0_i32_0 : i32, i32, i32, i32
  }
  func.func @transform_1(%arg0: i32, %arg1: i32) -> (i32, i32, i32, i32) {
    %c0_i32 = arith.constant 0 : i32
    %c0_i32_0 = arith.constant 0 : i32
    %c0_i32_1 = arith.constant 0 : i32
    %c0_i32_2 = arith.constant 0 : i32
    return %arg0, %c0_i32, %c0_i32_0, %c0_i32_1 : i32, i32, i32, i32
  }
  func.func @transform_2(%arg0: i32, %arg1: i32) -> (i32, i32, i32, i32) {
    %c0_i32 = arith.constant 0 : i32
    %c0_i32_0 = arith.constant 0 : i32
    %c0_i32_1 = arith.constant 0 : i32
    %c0_i32_2 = arith.constant 0 : i32
    return %arg0, %c0_i32, %c0_i32_0, %c0_i32_1 : i32, i32, i32, i32
  }
  func.func @transform_3(%arg0: i32, %arg1: i32) -> (i32, i32, i32, i32) {
    %c0_i32 = arith.constant 0 : i32
    %c0_i32_0 = arith.constant 0 : i32
    %c0_i32_1 = arith.constant 0 : i32
    return %arg0, %c0_i32, %arg1, %c0_i32_0 : i32, i32, i32, i32
  }
}

</mosaic_0001>

<bundles_post_ra>
// kernel: tpu_custom_call.1
= control target key start
LH: loop header
LB: loop body
LE: loop exit
PB: predicated region body
PF: predicated region fallthrough
CT: control target
= control target key end

     0   :  { %8 = vsyncpa [#allocation4], 0  ;;  %s2526_s0 = inlined_call_operand.vmem [shape: f32[4,8,16,16], index: 0, kind: input, shape index: {}]   ;;  %s2527_s1 = inlined_call_operand.vmem [shape: f32[4,8,24,18], index: 1, kind: input, shape index: {}]   ;;  %s2528_s2 = inlined_call_operand.vmem [shape: f32[4,8,24,18], index: 2, kind: input, shape index: {}]   ;;  %s2529_s3 = inlined_call_operand.hbm [shape: f32[4,8,16,16], index: 3, kind: output, shape index: {}]  }
   0x1   :  { %10 = vsyncpa [#allocation4 + $0x1], 0  ;;  %s1561_s12 = smov 0   ;;  %s1563_s13 = smov 0  }
   0x2   :  { %s1565_s14 = smov 0   ;;  %s1567_s15 = smov 0  }
   0x3   :  { %s1569_s16 = smov 0   ;;  %s1571_s17 = smov 0  }
   0x4   :  { %s1573_s18 = smov 0   ;;  %s1575_s19 = smov 0  }
   0x5 LB: > { %s1324_s20 = sadd.s32 4294967295, %s1533_s19   ;;  %s1325_s21 = sadd.s32 4294967294, %s1533_s19   ;;  %s1533_s19 = sphi %s1575_s19, %s16_s19   ;;  %s1529_s18 = sphi %s1573_s18, %s2540_s18   ;;  %s1525_s17 = sphi %s1571_s17, %s2539_s17   ;;  %s1521_s16 = sphi %s1569_s16, %s2538_s16   ;;  %s1517_s15 = sphi %s1567_s15, %s2537_s15   ;;  %s1513_s14 = sphi %s1565_s14, %s2536_s14   ;;  %s1509_s13 = sphi %s1563_s13, %s2535_s13   ;;  %s1505_s12 = sphi %s1561_s12, %s2534_s12  }
   0x6   : > { %s25_s22 = sadd.s32 1, %s1525_s17  ;;  %s28_s23 = sadd.s32 1, %s1529_s18 }
   0x7   : > { %p26_p0 = scmp.ge.s32.totalorder %s25_s22, 2  ;;  %p44_p1 = scmp.ne.s32.totalorder %s1513_s14, %s1509_s13 }
   0x8   : > { %p45_p2 = scmp.eq.s32.totalorder %s1533_s19, 0  ;;  %p128_p5 = scmp.eq.s32.totalorder %s1324_s20, 7 }
   0x9   : > { %s2542_s22 = smov (%p26_p0, %s25_s22), 0  ;;  %s2544_s23 = smov (!%p26_p0, %s28_s23), %s1529_s18 }
   0xa   : > { %s33_s24 = ssub.s32 %s1525_s17, %s2542_s22  ;;  %p1613_p3 = por %p45_p2, %p44_p1 }
   0xb   : > { %p30_p4 = scmp.ge.s32.totalorder %s2544_s23, 4  ;;  %p133_p6 = scmp.ne.s32.totalorder %s1509_s13, %s1505_s12 }
   0xc   : > { %p134_p7 = scmp.eq.s32.totalorder %s1325_s21, 7  ;;  %p1621_p8 = por %p128_p5, %p44_p1 }
   0xd   : > { %s2546_s23 = smov (%p30_p4, %s2544_s23), 0  ;;  %s37_s30 = sadd.s32 1, %s1513_s14 }
   0xe   : > { %p1625_p9 = por %p134_p7, %p133_p6  ;;  %s32_s28 = ssub.s32 %s1529_s18, %s2546_s23 }
   0xf   : > { %s34_s29 = sor.u32 %s33_s24, %s32_s28  ;;  %p1327_p11 = scmp.ge.s32.totalorder %s1533_s19, 8 }
  0x10   : > { %p35_p10 = scmp.eq.s32.totalorder %s34_s29, 0 }
  0x11   : > { %150 = sbr.rel (%p1327_p11) target bundleno = 34 (0x22), region = 16 }
  0x12   : > { %s1633_s4 = scalar_select %p35_p10, %s1513_s14, %s37_s30  }
  0x18   : > { %153 = sbr.rel (!%p1613_p3) target bundleno = 34 (0x22), region = 20  ;;  %s155_s5 = sand.u32 (%p1613_p3), 1, %s1513_s14  }
  0x19   : > { %s1329_s6 = sshll.u32 (%p1613_p3), %s1529_s18, 4  ;;  %s1328_s7 = sshll.u32 (%p1613_p3), %s155_s5, 6 }
  0x1a   : > { %s159_s8 = sadd.s32 (%p1613_p3), %s1525_s17, %s1329_s6  ;;  %s157_s21 = scalar_lea.vmem (%p1613_p3), [#allocation2], %s1328_s7 }
  0x1b   : > { %s1330_s9 = sshll.u32 (%p1613_p3), %s159_s8, 3 }
  0x1c   : > { %s161_s20 = scalar_lea.vmem (%p1613_p3), %s2526_s0, %s1330_s9 }
  0x1d   : > { %v203_v0 = vld [vmem:[%s161_s20] sm:$0xff] (%p1613_p3)  ;;  %v205_v1 = vld [vmem:[%s161_s20 + $0x10] sm:$0xff] (%p1613_p3) }
  0x1e   : > { %v207_v2 = vld [vmem:[%s161_s20 + $0x20] sm:$0xff] (%p1613_p3)  ;;  %204 = vst [vmem:[%s157_s21] sm:$0xff] (%p1613_p3), %v203_v0  ;;  %206 = vst [vmem:[%s157_s21 + $0x8] sm:$0xff] (%p1613_p3), %v205_v1  ;;  %v209_v3 = vld [vmem:[%s161_s20 + $0x30] sm:$0xff] (%p1613_p3) }
  0x1f   : > { %208 = vst [vmem:[%s157_s21 + $0x10] sm:$0xff] %v207_v2  ;;  %v211_v4 = vld [vmem:[%s161_s20 + $0x40] sm:$0xff]  ;;  %v213_v5 = vld [vmem:[%s161_s20 + $0x50] sm:$0xff]  ;;  %210 = vst [vmem:[%s157_s21 + $0x18] sm:$0xff] %v209_v3 }
  0x20   : > { %212 = vst [vmem:[%s157_s21 + $0x20] sm:$0xff] %v211_v4  ;;  %214 = vst [vmem:[%s157_s21 + $0x28] sm:$0xff] %v213_v5  ;;  %v215_v6 = vld [vmem:[%s161_s20 + $0x60] sm:$0xff]  ;;  %v217_v7 = vld [vmem:[%s161_s20 + $0x70] sm:$0xff] }
  0x21   : > { %216 = vst [vmem:[%s157_s21 + $0x30] sm:$0xff] %v215_v6  ;;  %218 = vst [vmem:[%s157_s21 + $0x38] sm:$0xff] %v217_v7 }
  0x22 PF: > { %p1331_p12 = scmp.ge.s32.totalorder %s1533_s19, 1  ;;  %p239_p13 = scmp.lt.s32.totalorder %s1533_s19, 9 }
  0x24   : > { %p240_p0 = pnand %p1331_p12, %p239_p13 }
  0x25   : > { %p279_p1 = scmp.lt.s32.totalorder (!%p240_p0), %s1521_s16, 3  ;;  %s246_s24 = sand.u32 (!%p240_p0), 1, %s1509_s13   ;;  %vm340_vm0 = vcmask (!%p240_p0), 130048   ;;  %vm469_vm1 = vcmask (!%p240_p0), 1046528   ;;  %vm622_vm2 = vcmask (!%p240_p0), 1045504  }
  0x26   : > { %243 = sbr.rel (%p240_p0) target bundleno = 377 (0x179), region = 66  ;;  %s1336_s28 = sshll.u32 (!%p240_p0), %s1517_s15, 3 }
  0x27   : > { %s1652_s29 = sshll.u32 (!%p240_p0), %s246_s24, 6  ;;  %s1338_s5 = sshll.u32 (!%p240_p0), %s1521_s16, 4 }
  0x28   : > { %s1658_s8 = scalar_lea.vmem (!%p240_p0), [#allocation2], %s1652_s29  ;;  %s2474_s9 = scalar_lea.sflag (!%p240_p0), [#allocation4], %s246_s24 }
  0x29   : > { %v1661_v8 = vld [vmem:[%s1658_s8 + $0x10] sm:$0xff] (!%p240_p0)  ;;  %v1664_v9 = vld [vmem:[%s1658_s8] sm:$0xff] (!%p240_p0)  ;;  %v1672_v10 = vld [vmem:[%s1658_s8 + $0x18] sm:$0xff] (!%p240_p0) }
  0x2a   : > { %v1675_v11 = vld [vmem:[%s1658_s8 + $0x8] sm:$0xff] (!%p240_p0)  ;;  %v1715_v24 = vld [vmem:[%s1658_s8 + $0x20] sm:$0xff] (!%p240_p0)  ;;  %v1718_v25 = vld [vmem:[%s1658_s8 + $0x38] sm:$0xff] (!%p240_p0) }
  0x2b   : > { %v1678_v12 = vld [vmem:[%s1658_s8 + $0x28] sm:$0xff] (!%p240_p0)  ;;  %v1755_v43 = vld [vmem:[%s1658_s8 + $0x30] sm:$0xff] (!%p240_p0) }
  0x2d   : > { %s280_s25 = scalar_select %p279_p1, %s1521_s16, 3 }
  0x2f   : > { %s1342_s30 = smul.u32 192, %s280_s25  ;;  %s1535_s25 = smov 127  }
  0x31   : > { %s283_s7 = scalar_lea.vmem %s2527_s1, %s1342_s30  ;;  %s288_s11 = scalar_lea.vmem %s2528_s2, %s1342_s30 }
  0x32   : > { %s1669_s20 = scalar_lea.vmem %s283_s7, %s1336_s28  ;;  %s1680_s21 = scalar_lea.vmem %s288_s11, %s1336_s28 }
  0x33   : > { %v1683_v13 = vld [vmem:[%s1669_s20 + $0x30] sm:$0xff]  ;;  %v1686_v14 = vld [vmem:[%s1669_s20] sm:$0xff]  ;;  %v1689_v15 = vld [vmem:[%s1669_s20 + $0x48] sm:$0xff]  ;;  %s1536_s28 = smov 126   ;;  %s2440_s30 = scalar_lea.vmem [#allocation3], %s1652_s29 }
  0x34   : > { %369 = vrot.lane.b32.xlu1 %v1683_v13, %s1535_s25  ;;  %v334_v16 = vmul.f32 %v1683_v13, %v1661_v8  ;;  %365 = vrot.lane.b32.xlu0 %v1686_v14, %s1535_s25  ;;  %v332_v17 = vmul.f32 %v1686_v14, %v1664_v9  ;;  %v335_v18 = vmul.f32 %v1689_v15, %v1672_v10  ;;  %v1702_v19 = vld [vmem:[%s1669_s20 + $0x18] sm:$0xff]  ;;  %v1712_v23 = vld [vmem:[%s1669_s20 + $0x60] sm:$0xff]  ;;  %v470_v26 = vrot.slane %v1686_v14, 1  ;;  %s1210_s29 = sadd.s32 %s1517_s15, %s1338_s5  ;;  %s1213_s16 = sshll.u32 %s2440_s30, 4  ;;  %s2461_s16 = int_to_ptr.vmem [resolvable:$true] %s1213_s16 }
  0x35   : > { %v1705_v20 = vld [vmem:[%s1669_s20 + $0x78] sm:$0xff]  ;;  %v333_v21 = vmul.f32 %v1702_v19, %v1675_v11  ;;  %v336_v28 = vmul.f32 %v1712_v23, %v1715_v24  ;;  %v1725_v29 = vld [vmem:[%s1669_s20 + $0x20] sm:$0xff]  ;;  %v473_v30 = vrot.slane %v1702_v19, 1  ;;  %v1729_v31 = vld [vmem:[%s1669_s20 + $0x8] sm:$0xff]  ;;  %v479_v33 = vrot.slane %v1689_v15, 1  ;;  %s1339_s15 = sshll.u32 %s1210_s29, 7 }
  0x36   : > { %v337_v22 = vmul.f32 %v1705_v20, %v1678_v12  ;;  %v341_v27 = vsel %vm340_vm0, %v332_v17, 0.0  ;;  %v1732_v32 = vld [vmem:[%s1669_s20 + $0x50] sm:$0xff]  ;;  %v344_v34 = vsel %vm340_vm0, %v334_v16, 0.0  ;;  %v346_v35 = vsel %vm340_vm0, %v335_v18, 0.0  ;;  %v1740_v38 = vld [vmem:[%s1669_s20 + $0xa8] sm:$0xff]  ;;  %v1743_v39 = vld [vmem:[%s1669_s20 + $0x38] sm:$0xff]  ;;  %s2466_s8 = scalar_lea.hbm %s2529_s3, %s1339_s15 }
  0x37   : > { %v342_v36 = vsel %vm340_vm0, %v333_v21, 0.0  ;;  %v339_v41 = vmul.f32 %v1740_v38, %v1718_v25  ;;  %v1752_v42 = vld [vmem:[%s1669_s20 + $0x90] sm:$0xff]  ;;  %v474_v44 = vrot.slane %v1725_v29, 1  ;;  %v471_v45 = vrot.slane %v1729_v31, 1  ;;  %v1765_v50 = vld [vmem:[%s1669_s20 + $0x80] sm:$0xff]  ;;  %v1793_v63 = vld [vmem:[%s1669_s20 + $0x68] sm:$0xff] }
  0x38   : > { %v350_v37 = vsel %vm340_vm0, %v337_v22, 0.0  ;;  %371 = vrot.lane.b32.xlu1 %v1689_v15, %s1535_s25  ;;  %367 = vrot.lane.b32.xlu0 %v1702_v19, %s1535_s25  ;;  %v343_v40 = vadd.f32 %v342_v36, %v341_v27  ;;  %v348_v46 = vsel %vm340_vm0, %v336_v28, 0.0  ;;  %v338_v47 = vmul.f32 %v1752_v42, %v1755_v43  ;;  %v1805_v16 = vld [vmem:[%s1669_s20 + $0x98] sm:$0xff]  ;;  %s1439_s10 = scalar_lea.vmem %s2461_s16, 1024  ;;  %s1537_s11 = smov [#allocation3]  }
  0x39   : > { %v480_v48 = vrot.slane %v1732_v32, 1  ;;  %v476_v49 = vrot.slane %v1683_v13, 1  ;;  %v1768_v52 = vsel %vm469_vm1, %v473_v30, %v474_v44  ;;  %v1771_v53 = vsel %vm469_vm1, %v470_v26, %v471_v45  ;;  %p1440_p2 = scmp.ne.s32.totalorder %s2461_s16, %s1439_s10 }
  0x3a   : > { %v345_v51 = vadd.f32 %v344_v34, %v343_v40  ;;  %v477_v54 = vrot.slane %v1743_v39, 1  ;;  %v503_v55 = vmul.f32 %v1768_v52, %v1675_v11  ;;  %v502_v56 = vmul.f32 %v1771_v53, %v1664_v9 }
  0x3b   : > { %v1779_v57 = vsel %vm469_vm1, %v479_v33, %v480_v48  ;;  %v485_v58 = vrot.slane %v1705_v20, 1  ;;  %v486_v62 = vrot.slane %v1765_v50, 1  ;;  %v482_v3 = vrot.slane %v1712_v23, 1  ;;  %p1441_p3 = pnand %p1440_p2, %p1621_p8 }
  0x3c   : > { %375 = vrot.lane.b32.xlu1 %v1705_v20, %s1535_s25  ;;  %373 = vrot.lane.b32.xlu0 %v1712_v23, %s1535_s25  ;;  %v347_v59 = vadd.f32 %v346_v35, %v345_v51  ;;  %v505_v60 = vmul.f32 %v1779_v57, %v1672_v10  ;;  %v1789_v61 = vsel %vm469_vm1, %v476_v49, %v477_v54  ;;  %v511_v0 = vsel %vm340_vm0, %v503_v55, 0.0 }
  0x3d   : > { %v510_v1 = vsel %vm340_vm0, %v502_v56, 0.0  ;;  %v504_v2 = vmul.f32 %v1789_v61, %v1661_v8  ;;  %v352_v5 = vsel %vm340_vm0, %v338_v47, 0.0  ;;  %v1802_v7 = vsel %vm469_vm1, %v485_v58, %v486_v62  ;;  %p1442_p4 = pneg %p1441_p3 }
  0x3e   : > { %v349_v4 = vadd.f32 %v348_v46, %v347_v59  ;;  %v512_v6 = vadd.f32 %v511_v0, %v510_v1  ;;  %v515_v17 = vsel %vm340_vm0, %v505_v60, 0.0  ;;  %v507_v21 = vmul.f32 %v1802_v7, %v1678_v12 }
  0x3f   : > { %v513_v18 = vsel %vm340_vm0, %v504_v2, 0.0  ;;  %v483_v22 = vrot.slane %v1793_v63, 1  ;;  %v488_v28 = vrot.slane %v1752_v42, 1  ;;  %v354_v30 = vsel %vm340_vm0, %v339_v41, 0.0 }
  0x40   : > { %379 = vrot.lane.b32.xlu1 %v1740_v38, %s1535_s25  ;;  %377 = vrot.lane.b32.xlu0 %v1752_v42, %s1535_s25  ;;  %v351_v26 = vadd.f32 %v350_v37, %v349_v4  ;;  %v514_v27 = vadd.f32 %v513_v18, %v512_v6  ;;  %v489_v34 = vrot.slane %v1805_v16, 1  ;;  %v626_v35 = vrot.slane %v1702_v19, 2 }
  0x41   : > { %v1819_v33 = vsel %vm469_vm1, %v482_v3, %v483_v22  ;;  %v519_v37 = vsel %vm340_vm0, %v507_v21, 0.0  ;;  %v627_v41 = vrot.slane %v1725_v29, 2  ;;  %v623_v46 = vrot.slane %v1686_v14, 2 }
  0x42   : > { %v353_v36 = vadd.f32 %v352_v5, %v351_v26  ;;  %v506_v40 = vmul.f32 %v1819_v33, %v1715_v24  ;;  %v516_v44 = vadd.f32 %v515_v17, %v514_v27  ;;  %v1827_v45 = vsel %vm469_vm1, %v488_v28, %v489_v34 }
  0x43   : > { %v508_v49 = vmul.f32 %v1827_v45, %v1755_v43  ;;  %v624_v51 = vrot.slane %v1729_v31, 2  ;;  %v1842_v29 = vsel %vm622_vm2, %v626_v35, %v627_v41  ;;  %v629_v55 = vrot.slane %v1683_v13, 2 }
  0x44   : > { %v1831_v47 = vadd.f32 %v354_v30, %v353_v36  ;;  %415 = vrot.lane.b32.xlu1 %v1702_v19, %s1536_s28  ;;  %413 = vrot.lane.b32.xlu0 %v1686_v14, %s1536_s28  ;;  %v517_v48 = vsel %vm340_vm0, %v506_v40, 0.0  ;;  %v656_v19 = vmul.f32 %v1842_v29, %v1675_v11  ;;  %v630_v58 = vrot.slane %v1743_v39, 2  ;;  %v1892_v30 = vld [vmem:[%s1680_s21 + $0x20] sm:$0xff] }
  0x45   : > { %v518_v54 = vadd.f32 %v517_v48, %v516_v44  ;;  %v521_v56 = vsel %vm340_vm0, %v508_v49, 0.0  ;;  %v1849_v14 = vsel %vm622_vm2, %v623_v46, %v624_v51  ;;  %v632_v60 = vrot.slane %v1689_v15, 2  ;;  %v1909_v44 = vld [vmem:[%s1680_s21 + $0x18] sm:$0xff]  ;;  %v1918_v48 = vld [vmem:[%s1680_s21] sm:$0xff] }
  0x46   : > { %v655_v31 = vmul.f32 %v1849_v14, %v1664_v9  ;;  %v633_v62 = vrot.slane %v1732_v32, 2  ;;  %v664_v0 = vsel %vm340_vm0, %v656_v19, 0.0  ;;  %v1862_v1 = vsel %vm622_vm2, %v629_v55, %v630_v58 }
  0x47   : > { %v520_v59 = vadd.f32 %v519_v37, %v518_v54  ;;  %v635_v39 = vrot.slane %v1712_v23, 2  ;;  %v636_v2 = vrot.slane %v1793_v63, 2  ;;  %v638_v63 = vrot.slane %v1705_v20, 2  ;;  %v1912_v37 = vld [vmem:[%s1680_s21 + $0x8] sm:$0xff]  ;;  %v1923_v54 = vld [vmem:[%s1680_s21 + $0x50] sm:$0xff] }
  0x48   : > { %419 = vrot.lane.b32.xlu1 %v1689_v15, %s1536_s28  ;;  %417 = vrot.lane.b32.xlu0 %v1683_v13, %s1536_s28  ;;  %v663_v4 = vsel %vm340_vm0, %v655_v31, 0.0  ;;  %v657_v15 = vmul.f32 %v1862_v1, %v1661_v8  ;;  %v1872_v13 = vsel %vm622_vm2, %v632_v60, %v633_v62  ;;  %v639_v21 = vrot.slane %v1765_v50, 2  ;;  %v1895_v50 = vld [vmem:[%s1669_s20 + $0xb0] sm:$0xff]  ;;  %v1941_v62 = vld [vmem:[%s1680_s21 + $0x48] sm:$0xff]  ;;  %s1443_s20 = sshll.u32 %s1537_s11, 4  ;;  %s1444_s20 = int_to_ptr.vmem [resolvable:$false] %s1443_s20 }
  0x49   : > { %v1866_v3 = vadd.f32 %v521_v56, %v520_v59  ;;  %v665_v32 = vadd.f32 %v664_v0, %v663_v4  ;;  %v658_v5 = vmul.f32 %v1872_v13, %v1672_v10  ;;  %v1877_v6 = vsel %vm622_vm2, %v635_v39, %v636_v2  ;;  %v1935_v59 = vld [vmem:[%s1680_s21 + $0x38] sm:$0xff]  ;;  %v327_v2 = vld [vmem:[%s1680_s21 + $0x80] sm:$0xff]  ;;  %p1446_p5 = scmp.lt.s32.totalorder %s2461_s16, %s1444_s20 }
  0x4a   : > { %v666_v17 = vsel %vm340_vm0, %v657_v15, 0.0  ;;  %v659_v18 = vmul.f32 %v1877_v6, %v1715_v24  ;;  %v641_v27 = vrot.slane %v1752_v42, 2  ;;  %v642_v28 = vrot.slane %v1805_v16, 2  ;;  %v1952_v15 = vld [vmem:[%s1680_s21 + $0x78] sm:$0xff] }
  0x4b   : > { %v667_v22 = vadd.f32 %v666_v17, %v665_v32  ;;  %v668_v26 = vsel %vm340_vm0, %v658_v5, 0.0  ;;  %v645_v16 = vrot.slane %v1895_v50, 2  ;;  %v929_v49 = vrot.slane %v1909_v44, 1  ;;  %v325_v17 = vld [vmem:[%s1680_s21 + $0x68] sm:$0xff] }
  0x4c   : > { %423 = vrot.lane.b32.xlu1 %v1705_v20, %s1536_s28  ;;  %421 = vrot.lane.b32.xlu0 %v1712_v23, %s1536_s28  ;;  %v670_v34 = vsel %vm340_vm0, %v659_v18, 0.0  ;;  %v1899_v20 = vsel %vm622_vm2, %v638_v63, %v639_v21  ;;  %v644_v23 = vrot.slane %v1740_v38, 2  ;;  %v1905_v40 = vsel %vm622_vm2, %v641_v27, %v642_v28  ;;  %v331_v18 = vld [vmem:[%s1680_s21 + $0xb0] sm:$0xff] }
  0x4d   : > { %v669_v35 = vadd.f32 %v668_v26, %v667_v22  ;;  %v660_v36 = vmul.f32 %v1899_v20, %v1678_v12  ;;  %v661_v46 = vmul.f32 %v1905_v40, %v1755_v43  ;;  %v930_v51 = vrot.slane %v1892_v30, 1  ;;  %v1961_v22 = vld [vmem:[%s1680_s21 + $0x60] sm:$0xff] }
  0x4e   : > { %v1931_v19 = vsel %vm622_vm2, %v644_v23, %v645_v16  ;;  %v926_v58 = vrot.slane %v1918_v48, 1  ;;  %v927_v39 = vrot.slane %v1912_v37, 1  ;;  %v935_v32 = vrot.slane %v1941_v62, 1 }
  0x4f   : > { %v671_v55 = vadd.f32 %v670_v34, %v669_v35  ;;  %v672_v56 = vsel %vm340_vm0, %v660_v36, 0.0  ;;  %v674_v31 = vsel %vm340_vm0, %v661_v46, 0.0  ;;  %v662_v60 = vmul.f32 %v1931_v19, %v1718_v25  ;;  %v329_v34 = vld [vmem:[%s1680_s21 + $0x98] sm:$0xff]  ;;  %v1974_v35 = vld [vmem:[%s1680_s21 + $0xa8] sm:$0xff] }
  0x50   : > { %427 = vrot.lane.b32.xlu1 %v1740_v38, %s1536_s28  ;;  %425 = vrot.lane.b32.xlu0 %v1752_v42, %s1536_s28  ;;  %v1944_v42 = vld [vmem:[%s1680_s21 + $0x30] sm:$0xff]  ;;  %v1947_v0 = vsel %vm469_vm1, %v929_v49, %v930_v51  ;;  %v936_v5 = vrot.slane %v1923_v54, 1  ;;  %v1964_v26 = vsel %vm469_vm1, %v926_v58, %v927_v39  ;;  %v933_v27 = vrot.slane %v1935_v59, 1 }
  0x51   : > { %v673_v4 = vadd.f32 %v672_v56, %v671_v55  ;;  %v932_v63 = vrot.slane %v1944_v42, 1  ;;  %v676_v21 = vsel %vm340_vm0, %v662_v60, 0.0  ;;  %v941_v28 = vrot.slane %v1952_v15, 1  ;;  %v1981_v49 = vld [vmem:[%s1680_s21 + $0x90] sm:$0xff]  ;;  %s1445_s21 = scalar_lea.vmem %s1444_s20, 2048 }
  0x52   : > { %v1977_v36 = vsel %vm469_vm1, %v935_v32, %v936_v5  ;;  %v942_v16 = vrot.slane %v327_v2, 1  ;;  %v938_v46 = vrot.slane %v1961_v22, 1  ;;  %v939_v55 = vrot.slane %v325_v17, 1  ;;  %p1447_p6 = scmp.lt.s32.totalorder %s1445_s21, %s1439_s10 }
  0x53   : > { %v675_v23 = vadd.f32 %v674_v31, %v673_v4  ;;  %v1984_v51 = vsel %vm469_vm1, %v932_v63, %v933_v27  ;;  %v947_v56 = vrot.slane %v1974_v35, 1  ;;  %v948_v58 = vrot.slane %v331_v18, 1 }
  0x54   : > { %528 = vrot.lane.b32.xlu1 %v1768_v52, %s1535_s25  ;;  %526 = vrot.lane.b32.xlu0 %v1771_v53, %s1535_s25  ;;  %v1990_v31 = vsel %vm469_vm1, %v941_v28, %v942_v16  ;;  %v944_v39 = vrot.slane %v1981_v49, 1  ;;  %v945_v4 = vrot.slane %v329_v34, 1  ;;  %v1994_v32 = vsel %vm469_vm1, %v938_v46, %v939_v55  ;;  %p1448_p7 = por %p1447_p6, %p1446_p5 }
  0x55   : > { %v1987_v60 = vadd.f32 %v676_v21, %v675_v23  ;;  %v1997_v5 = vsel %vm469_vm1, %v947_v56, %v948_v58  ;;  %v1057_v63 = vrot.slane %v1909_v44, 2  ;;  %v1058_v27 = vrot.slane %v1892_v30, 2 }
  0x56   : > { %v492_v21 = vrot.slane %v1895_v50, 1  ;;  %v2007_v28 = vsel %vm469_vm1, %v944_v39, %v945_v4  ;;  %v1054_v23 = vrot.slane %v1918_v48, 2  ;;  %v1055_v16 = vrot.slane %v1912_v37, 2  ;;  %p1449_p10 = pnand %p1448_p7, %p1442_p4 }
  0x57   : > { %v2012_v46 = vsel %vm622_vm2, %v1057_v63, %v1058_v27  ;;  %v1063_v30 = vrot.slane %v1941_v62, 2  ;;  %v1064_v55 = vrot.slane %v1923_v54, 2  ;;  %v1060_v56 = vrot.slane %v1944_v42, 2 }
  0x58   : > { %532 = vrot.lane.b32.xlu1 %v1779_v57, %s1535_s25  ;;  %530 = vrot.lane.b32.xlu0 %v1789_v61, %s1535_s25  ;;  %v2018_v58 = vsel %vm622_vm2, %v1054_v23, %v1055_v16  ;;  %v1061_v50 = vrot.slane %v1935_v59, 2  ;;  %v1069_v39 = vrot.slane %v1952_v15, 2  ;;  %v1070_v4 = vrot.slane %v327_v2, 2 }
  0x59   : > { %v2023_v41 = vsel %vm622_vm2, %v1063_v30, %v1064_v55  ;;  %v1066_v37 = vrot.slane %v1961_v22, 2  ;;  %v1067_v63 = vrot.slane %v325_v17, 2  ;;  %v2533_v54 = vrot.slane %v1740_v38, 1 }
  0x5a   : > { %v2036_v59 = vsel %vm622_vm2, %v1060_v56, %v1061_v50  ;;  %v2039_v2 = vsel %vm622_vm2, %v1069_v39, %v1070_v4  ;;  %v1075_v17 = vrot.slane %v1974_v35, 2  ;;  %v1076_v16 = vrot.slane %v331_v18, 2 }
  0x5b   : > { %v2033_v27 = vsel %vm469_vm1, %v2533_v54, %v492_v21  ;;  %v2042_v23 = vsel %vm622_vm2, %v1066_v37, %v1067_v63  ;;  %v1072_v30 = vrot.slane %v1981_v49, 2  ;;  %v1073_v55 = vrot.slane %v329_v34, 2 }
  0x5c   : > { %536 = vrot.lane.b32.xlu1 %v1802_v7, %s1535_s25  ;;  %534 = vrot.lane.b32.xlu0 %v1819_v33, %s1535_s25  ;;  %v2047_v38 = vsel %vm622_vm2, %v1075_v17, %v1076_v16 }
  0x5d   : > { %v2054_v21 = vsel %vm622_vm2, %v1072_v30, %v1073_v55 }
  0x60   : > { %540 = vrot.lane.b32.xlu1 %v2033_v27, %s1535_s25  ;;  %538 = vrot.lane.b32.xlu0 %v1827_v45, %s1535_s25 }
  0x64   : > { %576 = vrot.lane.b32.xlu1 %v1768_v52, %s1536_s28  ;;  %574 = vrot.lane.b32.xlu0 %v1771_v53, %s1536_s28 }
  0x68   : > { %580 = vrot.lane.b32.xlu1 %v1779_v57, %s1536_s28  ;;  %578 = vrot.lane.b32.xlu0 %v1789_v61, %s1536_s28 }
  0x6c   : > { %584 = vrot.lane.b32.xlu1 %v1802_v7, %s1536_s28  ;;  %582 = vrot.lane.b32.xlu0 %v1819_v33, %s1536_s28 }
  0x70   : > { %681 = vrot.lane.b32.xlu1 %v1842_v29, %s1535_s25  ;;  %679 = vrot.lane.b32.xlu0 %v1849_v14, %s1535_s25 }
  0x74   : > { %727 = vrot.lane.b32.xlu1 %v1849_v14, %s1536_s28  ;;  %683 = vrot.lane.b32.xlu0 %v1862_v1, %s1535_s25 }
  0x78   : > { %685 = vrot.lane.b32.xlu1 %v1872_v13, %s1535_s25  ;;  %729 = vrot.lane.b32.xlu0 %v1842_v29, %s1536_s28 }
  0x7c   : > { %586 = vrot.lane.b32.xlu1 %v1827_v45, %s1536_s28  ;;  %731 = vrot.lane.b32.xlu0 %v1862_v1, %s1536_s28 }
  0x80   : > { %733 = vrot.lane.b32.xlu1 %v1872_v13, %s1536_s28  ;;  %687 = vrot.lane.b32.xlu0 %v1877_v6, %s1535_s25 }
  0x84   : > { %689 = vrot.lane.b32.xlu1 %v1899_v20, %s1535_s25  ;;  %588 = vrot.lane.b32.xlu0 %v2033_v27, %s1536_s28 }
  0x88   : > { %691 = vrot.lane.b32.xlu1 %v1905_v40, %s1535_s25  ;;  %735 = vrot.lane.b32.xlu0 %v1877_v6, %s1536_s28 }
  0x8c   : > { %693 = vrot.lane.b32.xlu1 %v1931_v19, %s1535_s25  ;;  %737 = vrot.lane.b32.xlu0 %v1899_v20, %s1536_s28 }
  0x90   : > { %741 = vrot.lane.b32.xlu1 %v1931_v19, %s1536_s28  ;;  %739 = vrot.lane.b32.xlu0 %v1905_v40, %s1536_s28 }
  0x94   : > { %840 = vrot.lane.b32.xlu1 %v1909_v44, %s1535_s25  ;;  %838 = vrot.lane.b32.xlu0 %v1918_v48, %s1535_s25 }
  0x98   : > { %844 = vrot.lane.b32.xlu1 %v1941_v62, %s1535_s25  ;;  %842 = vrot.lane.b32.xlu0 %v1944_v42, %s1535_s25 }
  0x9c   : > { %848 = vrot.lane.b32.xlu1 %v1952_v15, %s1535_s25  ;;  %846 = vrot.lane.b32.xlu0 %v1961_v22, %s1535_s25 }
  0xa0   : > { %852 = vrot.lane.b32.xlu1 %v1974_v35, %s1535_s25  ;;  %850 = vrot.lane.b32.xlu0 %v1981_v49, %s1535_s25 }
  0xa4   : > { %880 = vrot.lane.b32.xlu1 %v1909_v44, %s1536_s28  ;;  %878 = vrot.lane.b32.xlu0 %v1918_v48, %s1536_s28 }
  0xa6   : > { %v370_v52 = vpop.permute.xlu1 %369  ;;  %v366_v53 = vpop.permute.xlu0 %365 }
  0xa7   : > { %v389_v57 = vmul.f32 %v366_v53, %v1664_v9  ;;  %v391_v33 = vmul.f32 %v370_v52, %v1661_v8 }
  0xa8   : > { %884 = vrot.lane.b32.xlu1 %v1941_v62, %s1536_s28  ;;  %882 = vrot.lane.b32.xlu0 %v1944_v42, %s1536_s28 }
  0xa9   : > { %v397_v29 = vsel %vm340_vm0, %v389_v57, 0.0  ;;  %v400_v40 = vsel %vm340_vm0, %v391_v33, 0.0 }
  0xaa   : > { %v372_v61 = vpop.permute.xlu1 %371  ;;  %v368_v7 = vpop.permute.xlu0 %367 }
  0xab   : > { %v390_v45 = vmul.f32 %v368_v7, %v1675_v11  ;;  %v392_v14 = vmul.f32 %v372_v61, %v1672_v10 }
  0xac   : > { %888 = vrot.lane.b32.xlu1 %v1952_v15, %s1536_s28  ;;  %886 = vrot.lane.b32.xlu0 %v1961_v22, %s1536_s28 }
  0xad   : > { %v398_v1 = vsel %vm340_vm0, %v390_v45, 0.0  ;;  %v402_v34 = vsel %vm340_vm0, %v392_v14, 0.0  ;;  %v2165_v14 = vmul.f32 0.35355338, %v1831_v47 }
  0xae   : > { %v399_v13 = vadd.f32 %v398_v1, %v397_v29  ;;  %v376_v6 = vpop.permute.xlu1 %375  ;;  %v374_v20 = vpop.permute.xlu0 %373 }
  0xaf   : > { %v393_v19 = vmul.f32 %v374_v20, %v1715_v24  ;;  %v394_v56 = vmul.f32 %v376_v6, %v1678_v12 }
  0xb0   : > { %v401_v18 = vadd.f32 %v400_v40, %v399_v13  ;;  %892 = vrot.lane.b32.xlu1 %v1974_v35, %s1536_s28  ;;  %890 = vrot.lane.b32.xlu0 %v1981_v49, %s1536_s28 }
  0xb1   : > { %v404_v37 = vsel %vm340_vm0, %v393_v19, 0.0  ;;  %v406_v17 = vsel %vm340_vm0, %v394_v56, 0.0 }
  0xb2   : > { %v403_v50 = vadd.f32 %v402_v34, %v401_v18  ;;  %v380_v39 = vpop.permute.xlu1 %379  ;;  %v378_v4 = vpop.permute.xlu0 %377 }
  0xb3   : > { %v395_v63 = vmul.f32 %v378_v4, %v1755_v43  ;;  %v396_v16 = vmul.f32 %v380_v39, %v1718_v25  ;;  %v509_v4 = vmul.f32 %v2033_v27, %v1718_v25 }
  0xb4   : > { %v405_v54 = vadd.f32 %v404_v37, %v403_v50  ;;  %976 = vrot.lane.b32.xlu1 %v1947_v0, %s1535_s25  ;;  %974 = vrot.lane.b32.xlu0 %v1964_v26, %s1535_s25 }
  0xb5   : > { %v408_v53 = vsel %vm340_vm0, %v395_v63, 0.0  ;;  %v410_v33 = vsel %vm340_vm0, %v396_v16, 0.0  ;;  %v523_v27 = vsel %vm340_vm0, %v509_v4, 0.0 }
  0xb6   : > { %v407_v30 = vadd.f32 %v406_v17, %v405_v54  ;;  %v416_v55 = vpop.permute.xlu1 %415  ;;  %v414_v52 = vpop.permute.xlu0 %413 }
  0xb7   : > { %v438_v57 = vmul.f32 %v416_v55, %v1675_v11  ;;  %v437_v61 = vmul.f32 %v414_v52, %v1664_v9 }
  0xb8   : > { %v409_v7 = vadd.f32 %v408_v53, %v407_v30  ;;  %980 = vrot.lane.b32.xlu1 %v1977_v36, %s1535_s25  ;;  %978 = vrot.lane.b32.xlu0 %v1984_v51, %s1535_s25 }
  0xb9   : > { %v446_v45 = vsel %vm340_vm0, %v438_v57, 0.0  ;;  %v445_v29 = vsel %vm340_vm0, %v437_v61, 0.0 }
  0xba   : > { %v411_v1 = vadd.f32 %v410_v33, %v409_v7  ;;  %v447_v13 = vadd.f32 %v446_v45, %v445_v29  ;;  %v420_v6 = vpop.permute.xlu1 %419  ;;  %v418_v20 = vpop.permute.xlu0 %417  ;;  %v524_v45 = vadd.f32 %v523_v27, %v1866_v3 }
  0xbb   : > { %v440_v40 = vmul.f32 %v420_v6, %v1672_v10  ;;  %v439_v19 = vmul.f32 %v418_v20, %v1661_v8 }
  0xbc   : > { %v2169_v18 = vmul.f32 0.35355338, %v411_v1  ;;  %984 = vrot.lane.b32.xlu1 %v1990_v31, %s1535_s25  ;;  %982 = vrot.lane.b32.xlu0 %v1994_v32, %s1535_s25 }
  0xbd   : > { %v448_v34 = vsel %vm340_vm0, %v439_v19, 0.0  ;;  %v450_v37 = vsel %vm340_vm0, %v440_v40, 0.0 }
  0xbe   : > { %v775_v47 = vmax.f32 %v2165_v14, %v2169_v18  ;;  %v449_v56 = vadd.f32 %v448_v34, %v447_v13  ;;  %v424_v50 = vpop.permute.xlu1 %423  ;;  %v422_v39 = vpop.permute.xlu0 %421 }
  0xbf   : > { %v442_v63 = vmul.f32 %v424_v50, %v1678_v12  ;;  %v441_v54 = vmul.f32 %v422_v39, %v1715_v24 }
  0xc0   : > { %v451_v17 = vadd.f32 %v450_v37, %v449_v56  ;;  %988 = vrot.lane.b32.xlu1 %v1997_v5, %s1535_s25  ;;  %986 = vrot.lane.b32.xlu0 %v2007_v28, %s1535_s25  ;;  %v2207_v56 = vmul.f32 0.35355338, %v524_v45 }
  0xc1   : > { %v452_v16 = vsel %vm340_vm0, %v441_v54, 0.0  ;;  %v454_v53 = vsel %vm340_vm0, %v442_v63, 0.0 }
  0xc2   : > { %v453_v30 = vadd.f32 %v452_v16, %v451_v17  ;;  %v428_v55 = vpop.permute.xlu1 %427  ;;  %v426_v52 = vpop.permute.xlu0 %425 }
  0xc3   : > { %v444_v57 = vmul.f32 %v428_v55, %v1718_v25  ;;  %v443_v61 = vmul.f32 %v426_v52, %v1755_v43 }
  0xc4   : > { %v455_v7 = vadd.f32 %v454_v53, %v453_v30  ;;  %1016 = vrot.lane.b32.xlu1 %v1947_v0, %s1536_s28  ;;  %1014 = vrot.lane.b32.xlu0 %v1964_v26, %s1536_s28 }
  0xc5   : > { %v456_v33 = vsel %vm340_vm0, %v443_v61, 0.0  ;;  %v458_v6 = vsel %vm340_vm0, %v444_v57, 0.0 }
  0xc6   : > { %v457_v29 = vadd.f32 %v456_v33, %v455_v7  ;;  %v529_v1 = vpop.permute.xlu1 %528  ;;  %v527_v13 = vpop.permute.xlu0 %526 }
  0xc7   : > { %v551_v20 = vmul.f32 %v529_v1, %v1675_v11  ;;  %v550_v40 = vmul.f32 %v527_v13, %v1664_v9 }
  0xc8   : > { %v459_v19 = vadd.f32 %v458_v6, %v457_v29  ;;  %1020 = vrot.lane.b32.xlu1 %v1977_v36, %s1536_s28  ;;  %1018 = vrot.lane.b32.xlu0 %v1984_v51, %s1536_s28 }
  0xc9   : > { %v559_v34 = vsel %vm340_vm0, %v551_v20, 0.0  ;;  %v558_v3 = vsel %vm340_vm0, %v550_v40, 0.0 }
  0xca   : > { %v2209_v50 = vmul.f32 0.35355338, %v459_v19  ;;  %v560_v39 = vadd.f32 %v559_v34, %v558_v3  ;;  %v533_v4 = vpop.permute.xlu1 %532  ;;  %v531_v37 = vpop.permute.xlu0 %530 }
  0xcb   : > { %v553_v63 = vmul.f32 %v533_v4, %v1672_v10  ;;  %v552_v54 = vmul.f32 %v531_v37, %v1661_v8 }
  0xcc   : > { %v776_v17 = vmax.f32 %v775_v47, %v2209_v50  ;;  %1024 = vrot.lane.b32.xlu1 %v1990_v31, %s1536_s28  ;;  %1022 = vrot.lane.b32.xlu0 %v1994_v32, %s1536_s28 }
  0xcd   : > { %v561_v16 = vsel %vm340_vm0, %v552_v54, 0.0  ;;  %v563_v53 = vsel %vm340_vm0, %v553_v63, 0.0 }
  0xce   : > { %v562_v30 = vadd.f32 %v561_v16, %v560_v39  ;;  %v537_v55 = vpop.permute.xlu1 %536  ;;  %v535_v52 = vpop.permute.xlu0 %534  ;;  %v777_v27 = vmax.f32 %v776_v17, %v2207_v56 }
  0xcf   : > { %v555_v57 = vmul.f32 %v537_v55, %v1678_v12  ;;  %v554_v61 = vmul.f32 %v535_v52, %v1715_v24 }
  0xd0   : > { %v564_v47 = vadd.f32 %v563_v53, %v562_v30  ;;  %1028 = vrot.lane.b32.xlu1 %v1997_v5, %s1536_s28  ;;  %1026 = vrot.lane.b32.xlu0 %v2007_v28, %s1536_s28 }
  0xd1   : > { %v565_v7 = vsel %vm340_vm0, %v554_v61, 0.0  ;;  %v567_v1 = vsel %vm340_vm0, %v555_v57, 0.0 }
  0xd2   : > { %v566_v33 = vadd.f32 %v565_v7, %v564_v47  ;;  %v541_v45 = vpop.permute.xlu1 %540  ;;  %v539_v29 = vpop.permute.xlu0 %538 }
  0xd3   : > { %v557_v13 = vmul.f32 %v541_v45, %v1718_v25  ;;  %v556_v6 = vmul.f32 %v539_v29, %v1755_v43 }
  0xd4   : > { %v568_v20 = vadd.f32 %v567_v1, %v566_v33  ;;  %1104 = vrot.lane.b32.xlu1 %v2012_v46, %s1535_s25  ;;  %1102 = vrot.lane.b32.xlu0 %v2018_v58, %s1535_s25 }
  0xd5   : > { %v569_v40 = vsel %vm340_vm0, %v556_v6, 0.0  ;;  %v571_v39 = vsel %vm340_vm0, %v557_v13, 0.0 }
  0xd6   : > { %v570_v19 = vadd.f32 %v569_v40, %v568_v20  ;;  %v577_v34 = vpop.permute.xlu1 %576  ;;  %v575_v3 = vpop.permute.xlu0 %574 }
  0xd7   : > { %v599_v55 = vmul.f32 %v577_v34, %v1675_v11  ;;  %v598_v52 = vmul.f32 %v575_v3, %v1664_v9 }
  0xd8   : > { %v572_v4 = vadd.f32 %v571_v39, %v570_v19  ;;  %1108 = vrot.lane.b32.xlu1 %v2023_v41, %s1535_s25  ;;  %1106 = vrot.lane.b32.xlu0 %v2036_v59, %s1535_s25 }
  0xd9   : > { %v606_v47 = vsel %vm340_vm0, %v598_v52, 0.0 }
  0xda   : > { %v2241_v37 = vmul.f32 0.35355338, %v572_v4  ;;  %v581_v63 = vpop.permute.xlu1 %580  ;;  %v579_v54 = vpop.permute.xlu0 %578 }
  0xdb   : > { %v600_v61 = vmul.f32 %v579_v54, %v1661_v8  ;;  %v601_v1 = vmul.f32 %v581_v63, %v1672_v10 }
  0xdc   : > { %1112 = vrot.lane.b32.xlu1 %v2039_v2, %s1535_s25  ;;  %1110 = vrot.lane.b32.xlu0 %v2042_v23, %s1535_s25  ;;  %v2248_v17 = vmax.f32 %v777_v27, %v2241_v37  ;;  %v607_v27 = vsel %vm340_vm0, %v599_v55, 0.0 }
  0xdd   : > { %v609_v45 = vsel %vm340_vm0, %v600_v61, 0.0  ;;  %v608_v29 = vadd.f32 %v607_v27, %v606_v47  ;;  %v611_v19 = vsel %vm340_vm0, %v601_v1, 0.0 }
  0xde   : > { %v585_v16 = vpop.permute.xlu1 %584  ;;  %v583_v30 = vpop.permute.xlu0 %582 }
  0xdf   : > { %v610_v13 = vadd.f32 %v609_v45, %v608_v29  ;;  %v602_v40 = vmul.f32 %v583_v30, %v1715_v24  ;;  %v603_v55 = vmul.f32 %v585_v16, %v1678_v12 }
  0xe0   : > { %1116 = vrot.lane.b32.xlu1 %v2047_v38, %s1535_s25  ;;  %1114 = vrot.lane.b32.xlu0 %v2054_v21, %s1535_s25 }
  0xe1   : > { %v612_v34 = vadd.f32 %v611_v19, %v610_v13  ;;  %v613_v4 = vsel %vm340_vm0, %v602_v40, 0.0  ;;  %v615_v16 = vsel %vm340_vm0, %v603_v55, 0.0 }
  0xe2   : > { %v682_v53 = vpop.permute.xlu1 %681  ;;  %v680_v57 = vpop.permute.xlu0 %679 }
  0xe3   : > { %v704_v63 = vmul.f32 %v682_v53, %v1675_v11  ;;  %v703_v54 = vmul.f32 %v680_v57, %v1664_v9  ;;  %v614_v61 = vadd.f32 %v613_v4, %v612_v34 }
  0xe4   : > { %1144 = vrot.lane.b32.xlu1 %v2012_v46, %s1536_s28  ;;  %1142 = vrot.lane.b32.xlu0 %v2018_v58, %s1536_s28 }
  0xe5   : > { %v712_v45 = vsel %vm340_vm0, %v704_v63, 0.0  ;;  %v711_v53 = vsel %vm340_vm0, %v703_v54, 0.0  ;;  %v616_v34 = vadd.f32 %v615_v16, %v614_v61 }
  0xe6   : > { %v728_v7 = vpop.permute.xlu1 %727  ;;  %v684_v33 = vpop.permute.xlu0 %683  ;;  %v713_v40 = vadd.f32 %v712_v45, %v711_v53 }
  0xe7   : > { %v705_v30 = vmul.f32 %v684_v33, %v1661_v8  ;;  %v751_v19 = vmul.f32 %v728_v7, %v1664_v9 }
  0xe8   : > { %1148 = vrot.lane.b32.xlu1 %v2023_v41, %s1536_s28  ;;  %1146 = vrot.lane.b32.xlu0 %v2036_v59, %s1536_s28 }
  0xe9   : > { %v714_v29 = vsel %vm340_vm0, %v705_v30, 0.0  ;;  %v759_v7 = vsel %vm340_vm0, %v751_v19, 0.0 }
  0xea   : > { %v686_v6 = vpop.permute.xlu1 %685  ;;  %v730_v20 = vpop.permute.xlu0 %729  ;;  %v715_v30 = vadd.f32 %v714_v29, %v713_v40 }
  0xeb   : > { %v706_v57 = vmul.f32 %v686_v6, %v1672_v10  ;;  %v752_v1 = vmul.f32 %v730_v20, %v1675_v11 }
  0xec   : > { %1152 = vrot.lane.b32.xlu1 %v2039_v2, %s1536_s28  ;;  %1150 = vrot.lane.b32.xlu0 %v2042_v23, %s1536_s28 }
  0xed   : > { %v716_v63 = vsel %vm340_vm0, %v706_v57, 0.0  ;;  %v760_v20 = vsel %vm340_vm0, %v752_v1, 0.0 }
  0xee   : > { %v587_v3 = vpop.permute.xlu1 %586  ;;  %v732_v39 = vpop.permute.xlu0 %731  ;;  %v717_v61 = vadd.f32 %v716_v63, %v715_v30 }
  0xef   : > { %v604_v52 = vmul.f32 %v587_v3, %v1755_v43  ;;  %v753_v6 = vmul.f32 %v732_v39, %v1661_v8 }
  0xf0   : > { %1156 = vrot.lane.b32.xlu1 %v2047_v38, %s1536_s28  ;;  %1154 = vrot.lane.b32.xlu0 %v2054_v21, %s1536_s28 }
  0xf1   : > { %v617_v13 = vsel %vm340_vm0, %v604_v52, 0.0  ;;  %v762_v39 = vsel %vm340_vm0, %v753_v6, 0.0 }
  0xf2   : > { %v734_v27 = vpop.permute.xlu1 %733  ;;  %v688_v47 = vpop.permute.xlu0 %687  ;;  %v618_v11 = vadd.f32 %v617_v13, %v616_v34 }
  0xf3   : > { %v707_v33 = vmul.f32 %v688_v47, %v1715_v24  ;;  %v754_v52 = vmul.f32 %v734_v27, %v1672_v10  ;;  %v678_v10 = vmul.f32 0.35355338, %v1987_v60  ;;  %v761_v27 = vadd.f32 %v760_v20, %v759_v7 }
  0xf5   : > { %v718_v47 = vsel %vm340_vm0, %v707_v33, 0.0  ;;  %v764_v33 = vsel %vm340_vm0, %v754_v52, 0.0  ;;  %v763_v19 = vadd.f32 %v762_v39, %v761_v27 }
  0xf6   : > { %v690_v3 = vpop.permute.xlu1 %689  ;;  %v589_v4 = vpop.permute.xlu0 %588  ;;  %v719_v1 = vadd.f32 %v718_v47, %v717_v61 }
  0xf7   : > { %v708_v54 = vmul.f32 %v690_v3, %v1678_v12  ;;  %v605_v55 = vmul.f32 %v589_v4, %v1718_v25  ;;  %v765_v60 = vadd.f32 %v764_v33, %v763_v19 }
  0xf9   : > { %v619_v9 = vsel %vm340_vm0, %v605_v55, 0.0  ;;  %v720_v57 = vsel %vm340_vm0, %v708_v54, 0.0 }
  0xfa   : > { %v620_v45 = vadd.f32 %v619_v9, %v618_v11  ;;  %v692_v53 = vpop.permute.xlu1 %691  ;;  %v736_v8 = vpop.permute.xlu0 %735  ;;  %v721_v34 = vadd.f32 %v720_v57, %v719_v1 }
  0xfb   : > { %v709_v16 = vmul.f32 %v692_v53, %v1755_v43  ;;  %v755_v29 = vmul.f32 %v736_v8, %v1715_v24 }
  0xfc   : > { %v621_v13 = vmul.f32 0.35355338, %v620_v45 }
  0xfd   : > { %v722_v40 = vsel %vm340_vm0, %v709_v16, 0.0  ;;  %v766_v6 = vsel %vm340_vm0, %v755_v29, 0.0 }
  0xfe   : > { %v779_v3 = vmax.f32 %v2248_v17, %v621_v13  ;;  %v694_v4 = vpop.permute.xlu1 %693  ;;  %v738_v63 = vpop.permute.xlu0 %737  ;;  %v723_v55 = vadd.f32 %v722_v40, %v721_v34  ;;  %v767_v52 = vadd.f32 %v766_v6, %v765_v60 }
  0xff   : > { %v710_v54 = vmul.f32 %v694_v4, %v1718_v25  ;;  %v756_v24 = vmul.f32 %v738_v63, %v1678_v12 }
 0x100   : > { %v780_v30 = vmax.f32 %v779_v3, %v678_v10 }
 0x101   : > { %v724_v11 = vsel %vm340_vm0, %v710_v54, 0.0  ;;  %v768_v20 = vsel %vm340_vm0, %v756_v24, 0.0 }
 0x102   : > { %v725_v47 = vadd.f32 %v724_v11, %v723_v55  ;;  %v742_v9 = vpop.permute.xlu1 %741  ;;  %v740_v7 = vpop.permute.xlu0 %739  ;;  %v769_v45 = vadd.f32 %v768_v20, %v767_v52 }
 0x103   : > { %v758_v17 = vmul.f32 %v742_v9, %v1718_v25  ;;  %v757_v61 = vmul.f32 %v740_v7, %v1755_v43 }
 0x104   : > { %v2319_v8 = vmul.f32 0.35355338, %v725_v47 }
 0x105   : > { %v770_v53 = vsel %vm340_vm0, %v757_v61, 0.0  ;;  %v772_v16 = vsel %vm340_vm0, %v758_v17, 0.0 }
 0x106   : > { %v771_v12 = vadd.f32 %v770_v53, %v769_v45  ;;  %v841_v39 = vpop.permute.xlu1 %840  ;;  %v839_v57 = vpop.permute.xlu0 %838  ;;  %v781_v27 = vmax.f32 %v780_v30, %v2319_v8 }
 0x108   : > { %v773_v29 = vadd.f32 %v772_v16, %v771_v12 }
 0x10a   : > { %v2323_v1 = vmul.f32 0.35355338, %v773_v29  ;;  %v845_v33 = vpop.permute.xlu1 %844  ;;  %v843_v40 = vpop.permute.xlu0 %842 }
 0x10c   : > { %v2326_v25 = vmax.f32 %v781_v27, %v2323_v1 }
 0x10e   : > { %v783_v43 = vsub.f32 %v2165_v14, %v2326_v25  ;;  %v786_v19 = vsub.f32 %v2169_v18, %v2326_v25  ;;  %v789_v34 = vsub.f32 %v2209_v50, %v2326_v25  ;;  %v792_v3 = vsub.f32 %v2207_v56, %v2326_v25  ;;  %v849_v4 = vpop.permute.xlu1 %848  ;;  %v847_v63 = vpop.permute.xlu0 %846 }
 0x10f   : > { %v795_v6 = vsub.f32 %v2241_v37, %v2326_v25  ;;  %v801_v54 = vsub.f32 %v678_v10, %v2326_v25  ;;  %v798_v56 = vsub.f32 %v621_v13, %v2326_v25  ;;  %v804_v7 = vsub.f32 %v2319_v8, %v2326_v25 }
 0x110   : > { %v784_v24 = vmul.f32 1.442695, %v783_v43  ;;  %v787_v60 = vmul.f32 1.442695, %v786_v19  ;;  %v790_v55 = vmul.f32 1.442695, %v789_v34  ;;  %v807_v17 = vsub.f32 %v2323_v1, %v2326_v25 }
 0x111   : > { %v793_v18 = vmul.f32 1.442695, %v792_v3  ;;  %v796_v20 = vmul.f32 1.442695, %v795_v6  ;;  %v802_v52 = vmul.f32 1.442695, %v801_v54 }
 0x112   : > { %1419 = vpow2.f32 %v784_v24  ;;  %v853_v14 = vpop.permute.xlu1 %852  ;;  %v851_v30 = vpop.permute.xlu0 %850  ;;  %v2342_v9 = vmul.f32 1.442695, %v798_v56 }
 0x113   : > { %1421 = vpow2.f32 %v787_v60 }
 0x114   : > { %1423 = vpow2.f32 %v790_v55 }
 0x115   : > { %1425 = vpow2.f32 %v793_v18 }
 0x116   : > { %v881_v50 = vpop.permute.xlu1 %880  ;;  %v879_v11 = vpop.permute.xlu0 %878  ;;  %1427 = vpow2.f32 %v796_v20 }
 0x117   : > { %1429 = vpow2.f32 %v802_v52 }
 0x118   : > { %1431 = vpow2.f32 %v2342_v9 }
 0x11a   : > { %v885_v47 = vpop.permute.xlu1 %884  ;;  %v883_v37 = vpop.permute.xlu0 %882 }
 0x11c   : > { %v2340_v10 = vpop.eup %1419 }
 0x11d   : > { %v2348_v61 = vpop.eup %1421  ;;  %v823_v13 = vmul.f32 %v2340_v10, %v1909_v44  ;;  %v822_v45 = vmul.f32 %v2340_v10, %v1918_v48  ;;  %v825_v53 = vmul.f32 %v2340_v10, %v1941_v62  ;;  %v824_v12 = vmul.f32 %v2340_v10, %v1944_v42 }
 0x11e   : > { %v863_v16 = vmul.f32 %v2348_v61, %v841_v39  ;;  %v862_v29 = vmul.f32 %v2348_v61, %v839_v57  ;;  %v865_v27 = vmul.f32 %v2348_v61, %v845_v33  ;;  %v864_v43 = vmul.f32 %v2348_v61, %v843_v40  ;;  %v889_v19 = vpop.permute.xlu1 %888  ;;  %v887_v34 = vpop.permute.xlu0 %886 }
 0x11f   : > { %v2362_v44 = vpop.eup %1423  ;;  %v827_v48 = vmul.f32 %v2340_v10, %v1952_v15  ;;  %v867_v62 = vmul.f32 %v2348_v61, %v849_v4  ;;  %v826_v42 = vmul.f32 %v2340_v10, %v1961_v22  ;;  %v866_v39 = vmul.f32 %v2348_v61, %v847_v63 }
 0x120   : > { %v871_v3 = vadd.f32 %v863_v16, %v823_v13  ;;  %v870_v57 = vadd.f32 %v862_v29, %v822_v45  ;;  %v873_v6 = vadd.f32 %v865_v27, %v825_v53  ;;  %v872_v33 = vadd.f32 %v864_v43, %v824_v12  ;;  %v2378_v20 = vpop.eup %1425 }
 0x121   : > { %v875_v54 = vadd.f32 %v867_v62, %v827_v48  ;;  %v874_v40 = vadd.f32 %v866_v39, %v826_v42  ;;  %v829_v24 = vmul.f32 %v2340_v10, %v1974_v35  ;;  %v869_v60 = vmul.f32 %v2348_v61, %v853_v14  ;;  %v1428_v53 = vpop.eup %1427 }
 0x122   : > { %v828_v15 = vmul.f32 %v2340_v10, %v1981_v49  ;;  %v868_v4 = vmul.f32 %v2348_v61, %v851_v30  ;;  %v903_v22 = vmul.f32 %v2362_v44, %v881_v50  ;;  %v902_v63 = vmul.f32 %v2362_v44, %v879_v11  ;;  %v893_v55 = vpop.permute.xlu1 %892  ;;  %v891_v18 = vpop.permute.xlu0 %890 }
 0x123   : > { %v877_v56 = vadd.f32 %v869_v60, %v829_v24  ;;  %v905_v52 = vmul.f32 %v2362_v44, %v885_v47  ;;  %v904_v35 = vmul.f32 %v2362_v44, %v883_v37  ;;  %v907_v14 = vmul.f32 %v2362_v44, %v889_v19  ;;  %v2385_v29 = vpop.eup %1429 }
 0x124   : > { %v876_v13 = vadd.f32 %v868_v4, %v828_v15  ;;  %v911_v45 = vadd.f32 %v903_v22, %v871_v3  ;;  %v910_v49 = vadd.f32 %v902_v63, %v870_v57  ;;  %v906_v30 = vmul.f32 %v2362_v44, %v887_v34 }
 0x125   : > { %v913_v50 = vadd.f32 %v905_v52, %v873_v6  ;;  %v912_v12 = vadd.f32 %v904_v35, %v872_v33  ;;  %v915_v11 = vadd.f32 %v907_v14, %v875_v54  ;;  %v909_v16 = vmul.f32 %v2362_v44, %v893_v55 }
 0x126   : > { %v914_v27 = vadd.f32 %v906_v30, %v874_v40  ;;  %v908_v47 = vmul.f32 %v2362_v44, %v891_v18  ;;  %v977_v43 = vpop.permute.xlu1 %976  ;;  %v959_v37 = vmul.f32 %v2378_v20, %v1947_v0  ;;  %v975_v19 = vpop.permute.xlu0 %974  ;;  %v958_v48 = vmul.f32 %v2378_v20, %v1964_v26 }
 0x127   : > { %v917_v34 = vadd.f32 %v909_v16, %v877_v56  ;;  %v999_v62 = vmul.f32 %v1428_v53, %v977_v43  ;;  %v998_v42 = vmul.f32 %v1428_v53, %v975_v19  ;;  %v961_v39 = vmul.f32 %v2378_v20, %v1977_v36 }
 0x128   : > { %v916_v3 = vadd.f32 %v908_v47, %v876_v13  ;;  %v967_v57 = vadd.f32 %v959_v37, %v911_v45  ;;  %v966_v6 = vadd.f32 %v958_v48, %v910_v49  ;;  %v960_v33 = vmul.f32 %v2378_v20, %v1984_v51 }
 0x129   : > { %v969_v54 = vadd.f32 %v961_v39, %v913_v50  ;;  %v963_v0 = vmul.f32 %v2378_v20, %v1990_v31  ;;  %v962_v40 = vmul.f32 %v2378_v20, %v1994_v32  ;;  %v965_v26 = vmul.f32 %v2378_v20, %v1997_v5 }
 0x12a   : > { %v1007_v24 = vadd.f32 %v999_v62, %v967_v57  ;;  %v1006_v60 = vadd.f32 %v998_v42, %v966_v6  ;;  %v981_v15 = vpop.permute.xlu1 %980  ;;  %v979_v36 = vpop.permute.xlu0 %978  ;;  %v968_v4 = vadd.f32 %v960_v33, %v912_v12  ;;  %v964_v22 = vmul.f32 %v2378_v20, %v2007_v28 }
 0x12b   : > { %v1001_v63 = vmul.f32 %v1428_v53, %v981_v15  ;;  %v1000_v51 = vmul.f32 %v1428_v53, %v979_v36  ;;  %v971_v55 = vadd.f32 %v963_v0, %v915_v11  ;;  %v970_v18 = vadd.f32 %v962_v40, %v914_v27 }
 0x12c   : > { %v973_v31 = vadd.f32 %v965_v26, %v917_v34  ;;  %v972_v56 = vadd.f32 %v964_v22, %v916_v3  ;;  %v805_v32 = vmul.f32 1.442695, %v804_v7  ;;  %v808_v28 = vmul.f32 1.442695, %v807_v17  ;;  %v1432_v17 = vpop.eup %1431 }
 0x12d   : > { %v1009_v5 = vadd.f32 %v1001_v63, %v969_v54  ;;  %v1008_v52 = vadd.f32 %v1000_v51, %v968_v4  ;;  %v810_v49 = vadd.f32 %v2348_v61, %v2340_v10  ;;  %v1087_v19 = vmul.f32 %v2385_v29, %v2012_v46 }
 0x12e   : > { %v985_v35 = vpop.permute.xlu1 %984  ;;  %v983_v14 = vpop.permute.xlu0 %982  ;;  %1433 = vpow2.f32 %v805_v32  ;;  %v1086_v34 = vmul.f32 %v2385_v29, %v2018_v58  ;;  %v1089_v46 = vmul.f32 %v2385_v29, %v2023_v41  ;;  %v1088_v58 = vmul.f32 %v2385_v29, %v2036_v59 }
 0x12f   : > { %v1003_v13 = vmul.f32 %v1428_v53, %v985_v35  ;;  %v1002_v45 = vmul.f32 %v1428_v53, %v983_v14  ;;  %v811_v50 = vadd.f32 %v2362_v44, %v810_v49  ;;  %1435 = vpow2.f32 %v808_v28 }
 0x130   : > { %v1093_v14 = vmul.f32 %v2385_v29, %v2047_v38  ;;  %v1092_v28 = vmul.f32 %v2385_v29, %v2054_v21 }
 0x131   : > { %v1011_v9 = vadd.f32 %v1003_v13, %v971_v55  ;;  %v1010_v30 = vadd.f32 %v1002_v45, %v970_v18  ;;  %v812_v16 = vadd.f32 %v2378_v20, %v811_v50  ;;  %v1091_v55 = vmul.f32 %v2385_v29, %v2039_v2 }
 0x132   : > { %v989_v8 = vpop.permute.xlu1 %988  ;;  %v987_v7 = vpop.permute.xlu0 %986  ;;  %v1090_v18 = vmul.f32 %v2385_v29, %v2042_v23 }
 0x133   : > { %v1005_v12 = vmul.f32 %v1428_v53, %v989_v8  ;;  %v1004_v11 = vmul.f32 %v1428_v53, %v987_v7  ;;  %v813_v25 = vadd.f32 %v1428_v53, %v812_v16 }
 0x135   : > { %v1013_v27 = vadd.f32 %v1005_v12, %v973_v31  ;;  %v1012_v1 = vadd.f32 %v1004_v11, %v972_v56  ;;  %v814_v61 = vadd.f32 %v1432_v17, %v813_v25 }
 0x136   : > { %v1017_v47 = vpop.permute.xlu1 %1016  ;;  %v1015_v43 = vpop.permute.xlu0 %1014 }
 0x137   : > { %v1039_v37 = vmul.f32 %v1432_v17, %v1017_v47  ;;  %v1038_v10 = vmul.f32 %v1432_v17, %v1015_v43  ;;  %v815_v62 = vadd.f32 %v2385_v29, %v814_v61 }
 0x138   : > { %v1434_v39 = vpop.eup %1433 }
 0x139   : > { %v1047_v44 = vadd.f32 %v1039_v37, %v1007_v24  ;;  %v1046_v48 = vadd.f32 %v1038_v10, %v1006_v60  ;;  %v816_v33 = vadd.f32 %v1434_v39, %v815_v62  ;;  %v2420_v54 = vpop.eup %1435 }
 0x13a   : > { %v1021_v20 = vpop.permute.xlu1 %1020  ;;  %v1019_v42 = vpop.permute.xlu0 %1018 }
 0x13b   : > { %v1041_v53 = vmul.f32 %v1432_v17, %v1021_v20  ;;  %v1040_v3 = vmul.f32 %v1432_v17, %v1019_v42  ;;  %v1095_v57 = vadd.f32 %v1087_v19, %v1047_v44  ;;  %v1094_v6 = vadd.f32 %v1086_v34, %v1046_v48 }
 0x13c   : > { %v817_v60 = vadd.f32 %v2420_v54, %v816_v33 }
 0x13d   : > { %v1049_v0 = vadd.f32 %v1041_v53, %v1009_v5  ;;  %v1048_v40 = vadd.f32 %v1040_v3, %v1008_v52 }
 0x13e   : > { %v1025_v26 = vpop.permute.xlu1 %1024  ;;  %v1023_v24 = vpop.permute.xlu0 %1022  ;;  %1437 = vrcp.f32 %v817_v60 }
 0x13f   : > { %v1043_v15 = vmul.f32 %v1432_v17, %v1025_v26  ;;  %v1042_v36 = vmul.f32 %v1432_v17, %v1023_v24  ;;  %v1097_v4 = vadd.f32 %v1089_v46, %v1049_v0  ;;  %v1096_v22 = vadd.f32 %v1088_v58, %v1048_v40 }
 0x141   : > { %v1051_v63 = vadd.f32 %v1043_v15, %v1011_v9  ;;  %v1050_v51 = vadd.f32 %v1042_v36, %v1010_v30 }
 0x142   : > { %v1029_v41 = vpop.permute.xlu1 %1028  ;;  %v1027_v31 = vpop.permute.xlu0 %1026 }
 0x143   : > { %v1045_v56 = vmul.f32 %v1432_v17, %v1029_v41  ;;  %v1044_v59 = vmul.f32 %v1432_v17, %v1027_v31  ;;  %v1099_v32 = vadd.f32 %v1091_v55, %v1051_v63  ;;  %v1098_v5 = vadd.f32 %v1090_v18, %v1050_v51 }
 0x145   : > { %v1053_v52 = vadd.f32 %v1045_v56, %v1013_v27  ;;  %v1052_v35 = vadd.f32 %v1044_v59, %v1012_v1 }
 0x146   : > { %v1105_v13 = vpop.permute.xlu1 %1104  ;;  %v1103_v2 = vpop.permute.xlu0 %1102 }
 0x147   : > { %v1127_v45 = vmul.f32 %v1434_v39, %v1105_v13  ;;  %v1126_v49 = vmul.f32 %v1434_v39, %v1103_v2  ;;  %v1101_v23 = vadd.f32 %v1093_v14, %v1053_v52  ;;  %v1100_v9 = vadd.f32 %v1092_v28, %v1052_v35 }
 0x148   : > { %v1438_v1 = vpop.eup %1437 }
 0x149   : > { %v1135_v30 = vadd.f32 %v1127_v45, %v1095_v57  ;;  %v1134_v50 = vadd.f32 %v1126_v49, %v1094_v6  ;;  %v819_v43 = vmul.f32 %v1438_v1, %v817_v60 }
 0x14a   : > { %v1109_v8 = vpop.permute.xlu1 %1108  ;;  %v1107_v7 = vpop.permute.xlu0 %1106 }
 0x14b   : > { %v1129_v12 = vmul.f32 %v1434_v39, %v1109_v8  ;;  %v1128_v11 = vmul.f32 %v1434_v39, %v1107_v7  ;;  %v820_v34 = vsub.f32 2.0, %v819_v43 }
 0x14d   : > { %v1137_v16 = vadd.f32 %v1129_v12, %v1097_v4  ;;  %v1136_v27 = vadd.f32 %v1128_v11, %v1096_v22  ;;  %v821_v3 = vmul.f32 %v1438_v1, %v820_v34 }
 0x14e   : > { %v1113_v25 = vpop.permute.xlu1 %1112  ;;  %v1111_v38 = vpop.permute.xlu0 %1110 }
 0x14f   : > { %v1131_v17 = vmul.f32 %v1434_v39, %v1113_v25  ;;  %v1130_v47 = vmul.f32 %v1434_v39, %v1111_v38 }
 0x151   : > { %v1139_v21 = vadd.f32 %v1131_v17, %v1099_v32  ;;  %v1138_v29 = vadd.f32 %v1130_v47, %v1098_v5 }
 0x152   : > { %v1117_v37 = vpop.permute.xlu1 %1116  ;;  %v1115_v10 = vpop.permute.xlu0 %1114 }
 0x153   : > { %v1133_v61 = vmul.f32 %v1434_v39, %v1117_v37  ;;  %v1132_v19 = vmul.f32 %v1434_v39, %v1115_v10 }
 0x155   : > { %v1141_v44 = vadd.f32 %v1133_v61, %v1101_v23  ;;  %v1140_v48 = vadd.f32 %v1132_v19, %v1100_v9 }
 0x156   : > { %v1145_v62 = vpop.permute.xlu1 %1144  ;;  %v1143_v20 = vpop.permute.xlu0 %1142 }
 0x157   : > { %v1167_v42 = vmul.f32 %v2420_v54, %v1145_v62  ;;  %v1166_v53 = vmul.f32 %v2420_v54, %v1143_v20 }
 0x159   : > { %v1175_v57 = vadd.f32 %v1167_v42, %v1135_v30  ;;  %v1174_v6 = vadd.f32 %v1166_v53, %v1134_v50 }
 0x15a   : > { %v1149_v33 = vpop.permute.xlu1 %1148  ;;  %v1147_v0 = vpop.permute.xlu0 %1146 }
 0x15b   : > { %v1183_v40 = vmul.f32 %v1175_v57, %v821_v3  ;;  %v1182_v46 = vmul.f32 %v1174_v6, %v821_v3  ;;  %v1169_v39 = vmul.f32 %v2420_v54, %v1149_v33  ;;  %v1168_v58 = vmul.f32 %v2420_v54, %v1147_v0 }
 0x15d   : > { %1191 = vst.msk [vmem:[%s2440_s30 + $0x8] sm:$0xff] %vm340_vm0, %v1183_v40  ;;  %1190 = vst.msk [vmem:[%s2440_s30] sm:$0xff] %vm340_vm0, %v1182_v46  ;;  %v1177_v26 = vadd.f32 %v1169_v39, %v1137_v16  ;;  %v1176_v24 = vadd.f32 %v1168_v58, %v1136_v27 }
 0x15e   : > { %v1153_v60 = vpop.permute.xlu1 %1152  ;;  %v1151_v15 = vpop.permute.xlu0 %1150 }
 0x15f   : > { %v1185_v36 = vmul.f32 %v1177_v26, %v821_v3  ;;  %v1184_v4 = vmul.f32 %v1176_v24, %v821_v3  ;;  %v1171_v22 = vmul.f32 %v2420_v54, %v1153_v60  ;;  %v1170_v63 = vmul.f32 %v2420_v54, %v1151_v15 }
 0x161   : > { %1193 = vst.msk [vmem:[%s2440_s30 + $0x18] sm:$0xff] %vm340_vm0, %v1185_v36  ;;  %1192 = vst.msk [vmem:[%s2440_s30 + $0x10] sm:$0xff] %vm340_vm0, %v1184_v4  ;;  %v1179_v51 = vadd.f32 %v1171_v22, %v1139_v21  ;;  %v1178_v55 = vadd.f32 %v1170_v63, %v1138_v29 }
 0x162   : > { %v1157_v18 = vpop.permute.xlu1 %1156  ;;  %v1155_v41 = vpop.permute.xlu0 %1154 }
 0x163   : > { %v1187_v31 = vmul.f32 %v1179_v51, %v821_v3  ;;  %v1186_v56 = vmul.f32 %v1178_v55, %v821_v3  ;;  %v1173_v59 = vmul.f32 %v2420_v54, %v1157_v18  ;;  %v1172_v32 = vmul.f32 %v2420_v54, %v1155_v41 }
 0x165   : > { %1195 = vst.msk [vmem:[%s2440_s30 + $0x28] sm:$0xff] %vm340_vm0, %v1187_v31  ;;  %1194 = vst.msk [vmem:[%s2440_s30 + $0x20] sm:$0xff] %vm340_vm0, %v1186_v56  ;;  %v1181_v5 = vadd.f32 %v1173_v59, %v1141_v44  ;;  %v1180_v52 = vadd.f32 %v1172_v32, %v1140_v48 }
 0x167   : > { %v1189_v35 = vmul.f32 %v1181_v5, %v821_v3  ;;  %v1188_v14 = vmul.f32 %v1180_v52, %v821_v3 }
 0x169   : > { %1197 = vst.msk [vmem:[%s2440_s30 + $0x38] sm:$0xff] %vm340_vm0, %v1189_v35  ;;  %1196 = vst.msk [vmem:[%s2440_s30 + $0x30] sm:$0xff] %vm340_vm0, %v1188_v14 }
 0x16a   : > { %1452 = shalt.err (!%p1449_p10)
}
 0x16b   : > { %s1453_s24 = scalar_lea.hbm %s2466_s8, 1024  ;;  %s1457_s30 = scalar_lea.hbm %s2529_s3, 8192 }
 0x16c   : > { %p1454_p11 = scmp.ne.s32.totalorder %s2466_s8, %s1453_s24  ;;  %p1458_p0 = scmp.lt.u32.totalorder %s2466_s8, %s2529_s3 }
 0x16d   : > { %p1459_p1 = scmp.lt.u32.totalorder %s1457_s30, %s1453_s24  ;;  %p1461_p3 = scmp.lt.u32.totalorder %s1453_s24, %s2466_s8 }
 0x16e   : > { %p1455_p12 = pnand %p1454_p11, %p1621_p8 }
 0x16f   : > { %p1460_p2 = por %p1459_p1, %p1458_p0 }
 0x170   : > { %p1456_p13 = pneg %p1455_p12 }
 0x171   : > { %p1462_p4 = por %p1461_p3, %p1460_p2 }
 0x173   : > { %p1463_p5 = pnand %p1462_p4, %p1456_p13 }
 0x175   : > { %1466 = shalt.err (!%p1463_p5)
}
 0x176   : > { %s1538_s15 = smov 128   ;;  %s1539_s6 = smov 256  }
 0x177   : > { %s1540_s7 = smov 8  }
 0x178   : > { %1343 = dma.vmem_to_hbm [thread:$0]  (%p1621_p8), %s2461_s16, 1024, %s2466_s8, %s2474_s9, %s1538_s15, %s1539_s6, %s1540_s7  }
 0x179 PF: > { %p1349_p6 = scmp.ge.s32.totalorder %s1533_s19, 2  ;;  %s1228_s10 = sand.u32 1, %s1505_s12  }
 0x17a   : > { %s1229_s11 = scalar_lea.sflag [#allocation4], %s1228_s10 }
 0x17b   : > { %p1346_p7 = pnand %p1349_p6, %p1625_p9 }
 0x17d   : > { %1500 = dma.done.wait (!%p1346_p7), %s1229_s11, 1024  }
 0x17e   : > { %1502 = vsyncadd (!%p1346_p7), %s1229_s11, 4294966272  ;;  %s16_s19 = sadd.s32 1, %s1533_s19   ;;  %s2534_s12 = smov %s1509_s13 }
 0x17f   : > { %p13_p10 = scmp.ge.s32.totalorder %s16_s19, 10   ;;  %s2535_s13 = smov %s1513_s14 }
 0x180   : > { %s2536_s14 = smov %s1633_s4  ;;  %s2537_s15 = smov %s1525_s17 }
 0x181   : > { %s2538_s16 = smov %s1529_s18  ;;  %s2539_s17 = smov %s2542_s22 }
 0x182   : > { %s2540_s18 = smov %s2546_s23  ;;  %15 = sbr.rel (!%p13_p10) target bundleno = 5 (0x5), region = 118 }
 0x189   :  { %1234 = vsyncpa [#allocation4], 1 }
 0x18a   :  { %1236 = vsyncpa [#allocation4 + $0x1], 1 }

</bundles_post_ra>
